<compile_context>
chip_gen: v5e
topology: v5e:2x2
jax: 0.10.0
libtpu: 0.0.40
codegen_flags: <defaults>
</compile_context>

<pallas_src>
import functools

import jax
import jax.numpy as jnp
from jax.experimental import pallas as pl
from jax.experimental.pallas import tpu as pltpu

DROPOUT_P = 0.2


# ---------------------------------------------------------------------------
# Kernel 1: fused Q/K/V projection over the flattened (B*T, C) row space.
# One bf16 MXU matmul per 256-row block (fills the 256x256 MXU on v6e/v7x).
# ---------------------------------------------------------------------------
def qkv_proj_kernel(x_ref, w_ref, q_ref, kv_ref, *, head_size):
    H = head_size
    qkv = jnp.dot(x_ref[...], w_ref[...],
                  preferred_element_type=jnp.float32)          # (RB, 3H) f32
    qkv = qkv.astype(jnp.bfloat16)
    # H is a multiple of 128 -> these lane slices are free (no relayout copy).
    q_ref[...] = qkv[:, :H]
    kv_ref[...] = qkv[:, H:]


# ---------------------------------------------------------------------------
# Kernel 2: causal attention for one (batch, query-tile) grid step.
# ---------------------------------------------------------------------------
def attn_kernel(seed_ref, q_ref, kv_ref, o_ref, *, head_size, q_block, training):
    H = head_size
    TQ = q_block
    q = q_ref[0]                 # (TQ, H)  bf16, softmax scale already folded in
    kv = kv_ref[0]               # (T, 2H)  bf16, resident across query tiles
    k = kv[:, :H]
    v = kv[:, H:]
    T = k.shape[0]

    # wei[t, s] = sum_h q[t, h] * k[s, h]  (contract head dim, no k.T relayout)
    wei = jax.lax.dot_general(
        q, k, dimension_numbers=(((1,), (1,)), ((), ())),
        preferred_element_type=jnp.float32)                    # (TQ, T) f32

    # Causal mask built in-kernel: 2 iotas + compare + select (VPU, no HBM buf).
    q_off = pl.program_id(1) * TQ
    row = jax.lax.broadcasted_iota(jnp.int32, (TQ, T), 0) + q_off
    col = jax.lax.broadcasted_iota(jnp.int32, (TQ, T), 1)
    wei = jnp.where(col <= row, wei, -1e30)      # finite fill -> no NaN risk

    # Numerically-stable softmax; divide goes to the EUP via approx reciprocal.
    wei = wei - jnp.max(wei, axis=-1, keepdims=True)
    p = jnp.exp(wei)
    inv = pl.reciprocal(jnp.sum(p, axis=-1, keepdims=True), approx=True)

    if training:
        # TODO(synk): hardware PRNG matches torch dropout's distribution, not
        # its exact RNG bitstream.
        inv = inv * (1.0 / (1.0 - DROPOUT_P))    # keep-scale folded into (TQ,1)
        pltpu.prng_seed(seed_ref[0]
                        + pl.program_id(0) * pl.num_programs(1)
                        + pl.program_id(1))
        bits = pltpu.prng_random_bits(p.shape)
        if bits.dtype != jnp.uint32:
            bits = pltpu.bitcast(bits, jnp.uint32)
        thresh = jnp.uint32(int(DROPOUT_P * (1 << 32)))  # integer threshold
        p = jnp.where(bits >= thresh, p, 0.0)

    p = p * inv

    # out = p @ v : bf16 operands on the MXU, f32 lane-dense (H=128) store.
    o_ref[0] = jnp.dot(p.astype(jnp.bfloat16), v,
                       preferred_element_type=jnp.float32)


def head_forward(x, wq, wk, wv, *, training=False, seed=0,
                 q_block=None, proj_rows=256):
    """x: (B, T, C) f32; wq/wk/wv: (C, H) f32 -> (B, T, H) f32."""
    B, T, C = x.shape
    H = wq.shape[1]
    assert H % 128 == 0, "head_size must be a multiple of 128 for free lane slicing"
    scale = float(C) ** -0.5   # matches the torch code: C ** (-0.5), C = n_embd

    # Fold the softmax scale into Wq (in f32, once, at trace time), fuse the
    # three projection weights, and cast everything the MXU consumes to bf16.
    w_qkv = jnp.concatenate([wq * scale, wk, wv], axis=1).astype(jnp.bfloat16)
    x2 = x.reshape(B * T, C).astype(jnp.bfloat16)              # bf16 in wrapper

    # --- Kernel 1: fused QKV projection on (B*T, C) rows ---------------------
    RB = min(proj_rows, B * T)    # 256-row LHS fills the 256x256 MXU on v6e/v7x
    q_flat, kv_flat = pl.pallas_call(
        functools.partial(qkv_proj_kernel, head_size=H),
        out_shape=(jax.ShapeDtypeStruct((B * T, H), jnp.bfloat16),
                   jax.ShapeDtypeStruct((B * T, 2 * H), jnp.bfloat16)),
        grid=(pl.cdiv(B * T, RB),),
        in_specs=[pl.BlockSpec((RB, C), lambda r: (r, 0)),
                  pl.BlockSpec((C, 3 * H), lambda r: (0, 0))],   # weight resident
        out_specs=(pl.BlockSpec((RB, H), lambda r: (r, 0)),
                   pl.BlockSpec((RB, 2 * H), lambda r: (r, 0))),
        compiler_params=pltpu.CompilerParams(
            dimension_semantics=("parallel",)),
    )(x2, w_qkv)

    q = q_flat.reshape(B, T, H)
    kv = kv_flat.reshape(B, T, 2 * H)

    # --- Kernel 2: causal attention, grid = (batch, query tile), both parallel
    if q_block is None:
        q_block = min(T, 128)
    assert T % q_block == 0, "demo path assumes T divisible by q_block"
    nq = T // q_block
    seed_arr = jnp.array([seed], dtype=jnp.int32)

    kernel = functools.partial(attn_kernel, head_size=H, q_block=q_block,
                               training=training)
    # TODO(synk): for large T add a KV-tile grid axis (last, "arbitrary") with
    # online-softmax VMEM scratch accumulators (flash) so the (q_block, T)
    # score/prob/bits intermediates never exceed VMEM (64 MiB on v7x, 16/32 MiB
    # default scoped on v5e/v6e).
    return pl.pallas_call(
        kernel,
        out_shape=jax.ShapeDtypeStruct((B, T, H), jnp.float32),
        grid=(B, nq),
        in_specs=[
            pl.BlockSpec(memory_space=pltpu.SMEM),                  # seed scalar
            pl.BlockSpec((1, q_block, H), lambda b, qi: (b, qi, 0)),  # Q tile
            pl.BlockSpec((1, T, 2 * H), lambda b, qi: (b, 0, 0)),     # K,V resident
        ],
        out_specs=pl.BlockSpec((1, q_block, H), lambda b, qi: (b, qi, 0)),
        compiler_params=pltpu.CompilerParams(
            dimension_semantics=("parallel", "parallel")),
    )(seed_arr, q, kv)


def head_ref(x, wq, wk, wv):
    """Pure-JAX f32 reference (eval mode, dropout = identity)."""
    B, T, C = x.shape
    q = x @ wq
    k = x @ wk
    v = x @ wv
    wei = (q @ jnp.swapaxes(k, -2, -1)) * (float(C) ** -0.5)
    tril = jnp.tril(jnp.ones((T, T), jnp.float32))
    wei = jnp.where(tril == 0, -jnp.inf, wei)
    wei = jax.nn.softmax(wei, axis=-1)
    return wei @ v


if __name__ == "__main__":
    # Module-consistent shapes: C = n_embd = 384 (fixed by the spec),
    # T = 128 <= sequence_len = 256, head_size = 128 (n_embd / 3 heads) so the
    # kernel output is lane-dense and B*T = 256 fills the projection MXU.
    B, T, C, H = 2, 128, 384, 128

    key = jax.random.PRNGKey(0)
    kx, kq, kk, kv = jax.random.split(key, 4)
    x = jax.random.normal(kx, (B, T, C), dtype=jnp.float32)

    # torch.nn.Linear(n_embd, head_size, bias=False) init: U(-1/sqrt(C), 1/sqrt(C));
    # weight is (H, C) in torch, we store the transpose (C, H).
    bound = 1.0 / (C ** 0.5)
    wq = jax.random.uniform(kq, (C, H), jnp.float32, -bound, bound)
    wk = jax.random.uniform(kk, (C, H), jnp.float32, -bound, bound)
    wv = jax.random.uniform(kv, (C, H), jnp.float32, -bound, bound)

    out = head_forward(x, wq, wk, wv, training=False)   # eval: dropout = id
    out = jax.block_until_ready(out)

    ref = head_ref(x, wq, wk, wv)
    assert out.shape == (B, T, H)
    max_err = float(jnp.max(jnp.abs(out - ref)))
    # bf16 MXU operands + approx reciprocal -> small, bounded numeric drift.
    assert jnp.allclose(out, ref, atol=2e-2, rtol=2e-2), max_err

    print("KERNEL_OK")
</pallas_src>

<mosaic_0001>
module attributes {stable_mosaic.version = 11 : i64} {
  func.func @qkv_proj_kernel(%arg0: i32, %arg1: memref<256x384xbf16, #tpu.memory_space<vmem>>, %arg2: memref<384x384xbf16, #tpu.memory_space<vmem>>, %arg3: memref<256x128xbf16, #tpu.memory_space<vmem>>, %arg4: memref<256x256xbf16, #tpu.memory_space<vmem>>) attributes {dimension_semantics = [#tpu.dimension_semantics<parallel>], iteration_bounds = array<i64: 1>, scalar_prefetch = 0 : i64, scratch_operands = 0 : i64, tpu.core_type = #tpu.core_type<tc>, window_params = [{transform_indices = @transform_0, window_bounds = array<i64: 256, 384>}, {pipeline_mode = #tpu.pipeline_mode<synchronous>, transform_indices = @transform_1, window_bounds = array<i64: 384, 384>}, {transform_indices = @transform_2, window_bounds = array<i64: 256, 128>}, {transform_indices = @transform_3, window_bounds = array<i64: 256, 256>}]} {
    %c0 = arith.constant 0 : index
    %c0_0 = arith.constant 0 : index
    %0 = vector.load %arg1[%c0, %c0_0] : memref<256x384xbf16, #tpu.memory_space<vmem>>, vector<256x384xbf16>
    %c0_1 = arith.constant 0 : index
    %c0_2 = arith.constant 0 : index
    %1 = vector.load %arg2[%c0_1, %c0_2] : memref<384x384xbf16, #tpu.memory_space<vmem>>, vector<384x384xbf16>
    %cst = arith.constant dense<0.000000e+00> : vector<256x384xf32>
    %2 = tpu.matmul %0, %1, %cst {dimension_numbers = #tpu.dot_dimension_numbers<[1], [0], [0], [1], [0, 0, 1, 1], [], []>} : vector<256x384xbf16>, vector<384x384xbf16>, vector<256x384xf32> -> vector<256x384xf32>
    %3 = arith.truncf %2 : vector<256x384xf32> to vector<256x384xbf16>
    %4 = vector.extract_strided_slice %3 {offsets = [0, 0], sizes = [256, 128], strides = [1, 1]} : vector<256x384xbf16> to vector<256x128xbf16>
    %c0_3 = arith.constant 0 : index
    %c0_4 = arith.constant 0 : index
    %5 = vector.load %arg3[%c0_3, %c0_4] : memref<256x128xbf16, #tpu.memory_space<vmem>>, vector<256x128xbf16>
    tpu.vector_store %arg3[%c0_3, %c0_4], %4 {strides = array<i32>} : memref<256x128xbf16, #tpu.memory_space<vmem>>, vector<256x128xbf16>,
    %6 = vector.extract_strided_slice %3 {offsets = [0, 128], sizes = [256, 256], strides = [1, 1]} : vector<256x384xbf16> to vector<256x256xbf16>
    %c0_5 = arith.constant 0 : index
    %c0_6 = arith.constant 0 : index
    %7 = vector.load %arg4[%c0_5, %c0_6] : memref<256x256xbf16, #tpu.memory_space<vmem>>, vector<256x256xbf16>
    tpu.vector_store %arg4[%c0_5, %c0_6], %6 {strides = array<i32>} : memref<256x256xbf16, #tpu.memory_space<vmem>>, vector<256x256xbf16>,
    return
  }
  func.func @transform_0(%arg0: i32) -> (i32, i32) {
    %c0_i32 = arith.constant 0 : i32
    %c0_i32_0 = arith.constant 0 : i32
    return %arg0, %c0_i32 : i32, i32
  }
  func.func @transform_1(%arg0: i32) -> (i32, i32) {
    %c0_i32 = arith.constant 0 : i32
    %c0_i32_0 = arith.constant 0 : i32
    %c0_i32_1 = arith.constant 0 : i32
    return %c0_i32, %c0_i32_0 : i32, i32
  }
  func.func @transform_2(%arg0: i32) -> (i32, i32) {
    %c0_i32 = arith.constant 0 : i32
    %c0_i32_0 = arith.constant 0 : i32
    return %arg0, %c0_i32 : i32, i32
  }
  func.func @transform_3(%arg0: i32) -> (i32, i32) {
    %c0_i32 = arith.constant 0 : i32
    %c0_i32_0 = arith.constant 0 : i32
    return %arg0, %c0_i32 : i32, i32
  }
}

</mosaic_0001>

<bundles_post_ra>
// kernel: tpu_custom_call.1
= control target key start
LH: loop header
LB: loop body
LE: loop exit
PB: predicated region body
PF: predicated region fallthrough
CT: control target
= control target key end

     0   :  { %9 = vsyncpa [#allocation3], 0  ;;  %s3474_s0 = inlined_call_operand.hbm [shape: bf16[256,384], index: 0, kind: input, shape index: {}]   ;;  %s3475_s1 = inlined_call_operand.hbm [shape: bf16[384,384], index: 1, kind: input, shape index: {}]   ;;  %s3476_s2 = inlined_call_operand.hbm [shape: bf16[256,128], index: 2, kind: output, shape index: {0}]   ;;  %s3477_s3 = inlined_call_operand.hbm [shape: bf16[256,256], index: 3, kind: output, shape index: {1}]  }
   0x1   :  { %10 = vsyncpa [#allocation6], 0 }
   0x2   :  { %11 = vsyncpa [#allocation4], 0 }
   0x3   :  { %12 = vsyncpa [#allocation9], 0  ;;  %s17_s14 = sshll.u32 %s3474_s0, 4  ;;  %s2840_s15 = smov [#allocation2]   ;;  %s18_s14 = int_to_ptr.hbm [resolvable:$true] %s17_s14 }
   0x4   :  { %s19_s16 = sshll.u32 %s2840_s15, 4  ;;  %s30_s19 = sshll.u32 %s3475_s1, 4  ;;  %s20_s16 = int_to_ptr.vmem [resolvable:$true] %s19_s16  ;;  %s31_s19 = int_to_ptr.hbm [resolvable:$true] %s30_s19 }
   0x5   :  { %s2841_s20 = smov 192   ;;  %s2842_s21 = smov 12  }
   0x6   :  { %25 = dma.hbm_to_vmem [thread:$0]  %s18_s14, 6144, %s20_s16, [#allocation3], %s2841_s20, %s2841_s20, %s2842_s21  }
   0x7   :  { %s2843_s22 = smov [#allocation5]  }
   0x8   :  { %s32_s23 = sshll.u32 %s2843_s22, 4  ;;  %s33_s23 = int_to_ptr.vmem [resolvable:$true] %s32_s23 }
   0x9   :  { %38 = dma.hbm_to_vmem [thread:$0]  %s31_s19, 9216, %s33_s23, [#allocation6], %s2841_s20, %s2841_s20, %s2842_s21  }
   0xa   :  { %2832 = dma.done.wait [#allocation3], 6144  }
   0xb   :  { %2833 = vsyncadd [#allocation3], 4294961152 }
   0xc   :  { %2834 = dma.done.wait [#allocation6], 9216  }
   0xd   :  { %2835 = vsyncadd [#allocation6], 4294958080  ;;  %v2285_v0 = vld [vmem:[#allocation5 + $0xa8] sm:$0xf]  ;;  %v2557_v1 = vld [vmem:[#allocation5 + $0xb0] sm:$0xf0] }
   0xe   :  { %v2273_v2 = vld [vmem:[#allocation5 + $0x90] sm:$0xf]  ;;  %v2286_v3 = vor.u32 %v2557_v1, %v2285_v0  ;;  %v2554_v4 = vld [vmem:[#allocation5 + $0x98] sm:$0xf0]  ;;  %v2261_v6 = vld [vmem:[#allocation5 + $0x78] sm:$0xf] }
   0xf   :  { %v2274_v5 = vor.u32 %v2554_v4, %v2273_v2  ;;  %v2551_v7 = vld [vmem:[#allocation5 + $0x80] sm:$0xf0]  ;;  %v2249_v9 = vld [vmem:[#allocation5 + $0x60] sm:$0xf]  ;;  %v2548_v10 = vld [vmem:[#allocation5 + $0x68] sm:$0xf0] }
  0x10   :  { %847 = vmatpush.bf16.msra.mxu0 %v2286_v3  ;;  %2702 = vmatpush.bf16.msra.mxu1 %v2286_v3  ;;  %v2262_v8 = vor.u32 %v2551_v7, %v2261_v6  ;;  %v2250_v11 = vor.u32 %v2548_v10, %v2249_v9  ;;  %v2237_v12 = vld [vmem:[#allocation5 + $0x48] sm:$0xf]  ;;  %v2545_v13 = vld [vmem:[#allocation5 + $0x50] sm:$0xf0]  ;;  %v2225_v15 = vld [vmem:[#allocation5 + $0x30] sm:$0xf] }
  0x11   :  { %2703 = vmatpush.bf16.msra.mxu2 %v2286_v3  ;;  %2704 = vmatpush.bf16.msra.mxu3 %v2286_v3  ;;  %v2238_v14 = vor.u32 %v2545_v13, %v2237_v12  ;;  %v2542_v16 = vld [vmem:[#allocation5 + $0x38] sm:$0xf0]  ;;  %v2213_v18 = vld [vmem:[#allocation5 + $0x18] sm:$0xf]  ;;  %v2539_v19 = vld [vmem:[#allocation5 + $0x20] sm:$0xf0] }
  0x12   :  { %v2226_v17 = vor.u32 %v2542_v16, %v2225_v15  ;;  %v2214_v20 = vor.u32 %v2539_v19, %v2213_v18  ;;  %v2201_v21 = vld [vmem:[#allocation5] sm:$0xf]  ;;  %v2536_v22 = vld [vmem:[#allocation5 + $0x8] sm:$0xf0]  ;;  %v2477_v27 = vld [vmem:[#allocation5 + $0x228] sm:$0xf] }
  0x13   :  { %v2009_v23 = vld [vmem:[#allocation2] sm:$0xf]  ;;  %v2488_v24 = vld [vmem:[#allocation2 + $0x8] sm:$0xf0]  ;;  %v2605_v28 = vld [vmem:[#allocation5 + $0x230] sm:$0xf0]  ;;  %v2202_v31 = vor.u32 %v2536_v22, %v2201_v21 }
  0x14   :  { %848 = vmatpush.bf16.msra.mxu0 %v2274_v5  ;;  %2705 = vmatpush.bf16.msra.mxu1 %v2274_v5  ;;  %v2057_v25 = vld [vmem:[#allocation2 + $0x60] sm:$0xf]  ;;  %v2500_v26 = vld [vmem:[#allocation2 + $0x68] sm:$0xf0]  ;;  %v2287_v30 = vld [vmem:[#allocation5 + $0xb4] sm:$0xf0]  ;;  %v2478_v38 = vor.u32 %v2605_v28, %v2477_v27  ;;  %v2876_v43 = vor.u32 %v2488_v24, %v2009_v23 }
  0x15   :  { %2706 = vmatpush.bf16.msra.mxu2 %v2274_v5  ;;  %2707 = vmatpush.bf16.msra.mxu3 %v2274_v5  ;;  %v2556_v29 = vld [vmem:[#allocation5 + $0xac] sm:$0xf]  ;;  %v2105_v32 = vld [vmem:[#allocation2 + $0xc0] sm:$0xf]  ;;  %v2381_v36 = vld [vmem:[#allocation5 + $0x168] sm:$0xf]  ;;  %v2878_v44 = vor.u32 %v2500_v26, %v2057_v25 }
  0x16   :  { %v2512_v33 = vld [vmem:[#allocation2 + $0xc8] sm:$0xf0]  ;;  %v2153_v34 = vld [vmem:[#allocation2 + $0x120] sm:$0xf]  ;;  %v2581_v37 = vld [vmem:[#allocation5 + $0x170] sm:$0xf0]  ;;  %v2290_v39 = vor.u32 %v2556_v29, %v2287_v30 }
  0x17   :  { %v2524_v35 = vld [vmem:[#allocation2 + $0x128] sm:$0xf0]  ;;  %v2465_v40 = vld [vmem:[#allocation5 + $0x210] sm:$0xf]  ;;  %v2383_v42 = vld [vmem:[#allocation5 + $0x174] sm:$0xf0]  ;;  %v2880_v48 = vor.u32 %v2512_v33, %v2105_v32  ;;  %v2382_v50 = vor.u32 %v2581_v37, %v2381_v36 }
  0x18   :  { %849 = vmatpush.bf16.msra.mxu0 %v2262_v8  ;;  %2708 = vmatpush.bf16.msra.mxu1 %v2262_v8  ;;  %v2580_v41 = vld [vmem:[#allocation5 + $0x16c] sm:$0xf]  ;;  %3526 = vst [vmem:[#allocation14_spill] sm:$0xff] %v2878_v44  ;;  %v2602_v45 = vld [vmem:[#allocation5 + $0x218] sm:$0xf0]  ;;  %v2882_v49 = vor.u32 %v2524_v35, %v2153_v34  ;;  %vm1872_vm0 = vcmask 1043456  }
  0x19   :  { %2709 = vmatpush.bf16.msra.mxu2 %v2262_v8  ;;  %2710 = vmatpush.bf16.msra.mxu3 %v2262_v8  ;;  %v2553_v46 = vld [vmem:[#allocation5 + $0x94] sm:$0xf]  ;;  %v2275_v47 = vld [vmem:[#allocation5 + $0x9c] sm:$0xf0]  ;;  %3527 = vst [vmem:[#allocation15_spill] sm:$0xff] %v2880_v48  ;;  %v2386_v51 = vor.u32 %v2580_v41, %v2383_v42  ;;  %v2466_v54 = vor.u32 %v2602_v45, %v2465_v40  ;;  %s2844_s0 = smov [#allocation7]  }
  0x1a   :  { %3528 = vst [vmem:[#allocation16_spill] sm:$0xff] %v2882_v49  ;;  %v2369_v52 = vld [vmem:[#allocation5 + $0x150] sm:$0xf]  ;;  %v2578_v53 = vld [vmem:[#allocation5 + $0x158] sm:$0xf0]  ;;  %v2278_v55 = vor.u32 %v2553_v46, %v2275_v47  ;;  %s1973_s1 = sshll.u32 %s2844_s0, 4  ;;  %s1974_s1 = int_to_ptr.vmem [resolvable:$true] %s1973_s1 }
  0x1b   :  { %v2453_v56 = vld [vmem:[#allocation5 + $0x1f8] sm:$0xf]  ;;  %v2577_v57 = vld [vmem:[#allocation5 + $0x154] sm:$0xf]  ;;  %v2371_v58 = vld [vmem:[#allocation5 + $0x15c] sm:$0xf0]  ;;  %v2370_v62 = vor.u32 %v2578_v53, %v2369_v52 }
  0x1c   :  { %850 = vmatpush.bf16.msra.mxu0 %v2250_v11  ;;  %2711 = vmatpush.bf16.msra.mxu1 %v2250_v11  ;;  %v2599_v59 = vld [vmem:[#allocation5 + $0x200] sm:$0xf0]  ;;  %v2550_v60 = vld [vmem:[#allocation5 + $0x7c] sm:$0xf]  ;;  %v2263_v61 = vld [vmem:[#allocation5 + $0x84] sm:$0xf0]  ;;  %v2374_v63 = vor.u32 %v2577_v57, %v2371_v58 }
  0x1d   :  { %2712 = vmatpush.bf16.msra.mxu2 %v2250_v11  ;;  %2713 = vmatpush.bf16.msra.mxu3 %v2250_v11  ;;  %v2357_v0 = vld [vmem:[#allocation5 + $0x138] sm:$0xf]  ;;  %v2575_v1 = vld [vmem:[#allocation5 + $0x140] sm:$0xf0]  ;;  %v2454_v2 = vor.u32 %v2599_v59, %v2453_v56  ;;  %v2266_v3 = vor.u32 %v2550_v60, %v2263_v61  ;;  %v2441_v4 = vld [vmem:[#allocation5 + $0x1e0] sm:$0xf] }
  0x1e   :  { %v2574_v5 = vld [vmem:[#allocation5 + $0x13c] sm:$0xf]  ;;  %v2359_v6 = vld [vmem:[#allocation5 + $0x144] sm:$0xf0]  ;;  %v2596_v7 = vld [vmem:[#allocation5 + $0x1e8] sm:$0xf0]  ;;  %v2358_v10 = vor.u32 %v2575_v1, %v2357_v0 }
  0x1f   :  { %v2547_v8 = vld [vmem:[#allocation5 + $0x64] sm:$0xf]  ;;  %v2251_v9 = vld [vmem:[#allocation5 + $0x6c] sm:$0xf0]  ;;  %v2362_v11 = vor.u32 %v2574_v5, %v2359_v6  ;;  %v2345_v12 = vld [vmem:[#allocation5 + $0x120] sm:$0xf]  ;;  %v2442_v18 = vor.u32 %v2596_v7, %v2441_v4 }
  0x20   :  { %851 = vmatpush.bf16.msra.mxu0 %v2238_v14  ;;  %2714 = vmatpush.bf16.msra.mxu1 %v2238_v14  ;;  %v2572_v13 = vld [vmem:[#allocation5 + $0x128] sm:$0xf0]  ;;  %v2491_v15 = vld [vmem:[#allocation2 + $0x20] sm:$0xf0]  ;;  %v2069_v16 = vld [vmem:[#allocation2 + $0x78] sm:$0xf]  ;;  %v2254_v19 = vor.u32 %v2547_v8, %v2251_v9 }
  0x21   :  { %2715 = vmatpush.bf16.msra.mxu2 %v2238_v14  ;;  %2716 = vmatpush.bf16.msra.mxu3 %v2238_v14  ;;  %v2021_v14 = vld [vmem:[#allocation2 + $0x18] sm:$0xf]  ;;  %v2571_v21 = vld [vmem:[#allocation5 + $0x124] sm:$0xf]  ;;  %v2347_v22 = vld [vmem:[#allocation5 + $0x12c] sm:$0xf0]  ;;  %v2346_v30 = vor.u32 %v2572_v13, %v2345_v12 }
  0x22   :  { %v2593_v23 = vld [vmem:[#allocation5 + $0x1d0] sm:$0xf0]  ;;  %v2544_v24 = vld [vmem:[#allocation5 + $0x4c] sm:$0xf]  ;;  %v2239_v25 = vld [vmem:[#allocation5 + $0x54] sm:$0xf0] }
  0x23   :  { %v2117_v26 = vld [vmem:[#allocation2 + $0xd8] sm:$0xf]  ;;  %v2515_v27 = vld [vmem:[#allocation2 + $0xe0] sm:$0xf0]  ;;  %v2333_v32 = vld [vmem:[#allocation5 + $0x108] sm:$0xf]  ;;  %v2242_v35 = vor.u32 %v2544_v24, %v2239_v25 }
  0x24   :  { %852 = vmatpush.bf16.msra.mxu0 %v2226_v17  ;;  %2717 = vmatpush.bf16.msra.mxu1 %v2226_v17  ;;  %v2165_v28 = vld [vmem:[#allocation2 + $0x138] sm:$0xf]  ;;  %v2527_v29 = vld [vmem:[#allocation2 + $0x140] sm:$0xf0]  ;;  %v2569_v33 = vld [vmem:[#allocation5 + $0x110] sm:$0xf0]  ;;  %v2892_v46 = vor.u32 %v2515_v27, %v2117_v26 }
  0x25   :  { %2718 = vmatpush.bf16.msra.mxu2 %v2226_v17  ;;  %2719 = vmatpush.bf16.msra.mxu3 %v2226_v17  ;;  %v2503_v17 = vld [vmem:[#allocation2 + $0x80] sm:$0xf0]  ;;  %v2417_v36 = vld [vmem:[#allocation5 + $0x1b0] sm:$0xf]  ;;  %v2568_v37 = vld [vmem:[#allocation5 + $0x10c] sm:$0xf]  ;;  %v2894_v47 = vor.u32 %v2527_v29, %v2165_v28 }
  0x26   :  { %v2890_v40 = vor.u32 %v2503_v17, %v2069_v16  ;;  %v2590_v41 = vld [vmem:[#allocation5 + $0x1b8] sm:$0xf0]  ;;  %v2541_v42 = vld [vmem:[#allocation5 + $0x34] sm:$0xf]  ;;  %v2227_v45 = vld [vmem:[#allocation5 + $0x3c] sm:$0xf0] }
  0x27   :  { %3530 = vst [vmem:[#allocation18_spill] sm:$0xff] %v2892_v46  ;;  %v2418_v52 = vor.u32 %v2590_v41, %v2417_v36  ;;  %v2230_v53 = vor.u32 %v2541_v42, %v2227_v45  ;;  %v2405_v56 = vld [vmem:[#allocation5 + $0x198] sm:$0xf]  ;;  %v2587_v58 = vld [vmem:[#allocation5 + $0x1a0] sm:$0xf0]  ;;  %s1975_s26 = sshll.u32 %s3476_s2, 4  ;;  %s1976_s26 = int_to_ptr.hbm [resolvable:$true] %s1975_s26 }
  0x28   :  { %853 = vmatpush.bf16.msra.mxu0 %v2214_v20  ;;  %2720 = vmatpush.bf16.msra.mxu1 %v2214_v20  ;;  %3529 = vst [vmem:[#allocation17_spill] sm:$0xff] %v2890_v40  ;;  %v2538_v59 = vld [vmem:[#allocation5 + $0x1c] sm:$0xf]  ;;  %v2215_v60 = vld [vmem:[#allocation5 + $0x24] sm:$0xf0]  ;;  %v2406_v61 = vor.u32 %v2587_v58, %v2405_v56  ;;  %s2845_s27 = smov 64  }
  0x29   :  { %2721 = vmatpush.bf16.msra.mxu2 %v2214_v20  ;;  %2722 = vmatpush.bf16.msra.mxu3 %v2214_v20  ;;  %v2429_v20 = vld [vmem:[#allocation5 + $0x1c8] sm:$0xf]  ;;  %3531 = vst [vmem:[#allocation19_spill] sm:$0xff] %v2894_v47  ;;  %v2323_v0 = vld [vmem:[#allocation5 + $0xfc] sm:$0xf0]  ;;  %s2846_s28 = smov 4  }
  0x2a   :  { %v2430_v34 = vor.u32 %v2593_v23, %v2429_v20  ;;  %v2309_v1 = vld [vmem:[#allocation5 + $0xd8] sm:$0xf]  ;;  %v2393_v4 = vld [vmem:[#allocation5 + $0x180] sm:$0xf]  ;;  %v2584_v5 = vld [vmem:[#allocation5 + $0x188] sm:$0xf0] }
  0x2b   :  { %v2535_v6 = vld [vmem:[#allocation5 + $0x4] sm:$0xf]  ;;  %v2203_v7 = vld [vmem:[#allocation5 + $0xc] sm:$0xf0]  ;;  %v2562_v8 = vld [vmem:[#allocation5 + $0xdc] sm:$0xf]  ;;  %v2394_v12 = vor.u32 %v2584_v5, %v2393_v4 }
  0x2c   :  { %854 = vmatpush.bf16.msra.mxu0 %v2202_v31  ;;  %2723 = vmatpush.bf16.msra.mxu1 %v2202_v31  ;;  %v2206_v13 = vor.u32 %v2535_v6, %v2203_v7  ;;  %v2559_v16 = vld [vmem:[#allocation5 + $0xc4] sm:$0xf]  ;;  %v2299_v17 = vld [vmem:[#allocation5 + $0xcc] sm:$0xf0]  ;;  %v2518_v23 = vld [vmem:[#allocation2 + $0xf8] sm:$0xf0] }
  0x2d   :  { %2724 = vmatpush.bf16.msra.mxu2 %v2202_v31  ;;  %2725 = vmatpush.bf16.msra.mxu3 %v2202_v31  ;;  %v2350_v31 = vor.u32 %v2571_v21, %v2347_v22  ;;  %v2081_v20 = vld [vmem:[#allocation2 + $0x90] sm:$0xf]  ;;  %v2506_v21 = vld [vmem:[#allocation2 + $0x98] sm:$0xf0]  ;;  %v2302_v27 = vor.u32 %v2559_v16, %v2299_v17  ;;  %v2141_v56 = vld [vmem:[#allocation2 + $0x108] sm:$0xf] }
  0x2e   :  { %v2129_v22 = vld [vmem:[#allocation2 + $0xf0] sm:$0xf]  ;;  %v2530_v25 = vld [vmem:[#allocation2 + $0x158] sm:$0xf0]  ;;  %v2902_v29 = vor.u32 %v2506_v21, %v2081_v20  ;;  %v2189_v58 = vld [vmem:[#allocation2 + $0x168] sm:$0xf] }
  0x2f   :  { %855 = vmatmul.bf16.vlgmr.msra.gmra.mxu0 %v2876_v43  ;;  %875 = vmatmul.bf16.vlgmr.msra.gmra.mxu1 %v2878_v44  ;;  %v2177_v24 = vld [vmem:[#allocation2 + $0x150] sm:$0xf]  ;;  %v2582_v36 = vld [vmem:[#allocation5 + $0x178] sm:$0xf0]  ;;  %v2281_v6 = vld [vmem:[#allocation5 + $0x98] sm:$0xf] }
  0x30   :  { %895 = vmatmul.bf16.vlgmr.msra.gmra.mxu2 %v2880_v48  ;;  %915 = vmatmul.bf16.vlgmr.msra.gmra.mxu3 %v2882_v49  ;;  %3532 = vst [vmem:[#allocation20_spill] sm:$0xff] %v2902_v29  ;;  %v2485_v45 = vld [vmem:[#allocation5 + $0x230] sm:$0xf]  ;;  %v2555_v7 = vld [vmem:[#allocation5 + $0xa0] sm:$0xf0]  ;;  %s2847_s2 = smov [#allocation8]  }
  0x31   :  { %1025 = vmatpush.bf16.msrb.mxu2 %v2478_v38  ;;  %1114 = vmatpush.bf16.msrb.mxu3 %v2290_v39  ;;  %v2335_v38 = vld [vmem:[#allocation5 + $0x114] sm:$0xf0]  ;;  %v2888_v39 = vor.u32 %v2491_v15, %v2021_v14  ;;  %v2560_v15 = vld [vmem:[#allocation5 + $0xc8] sm:$0xf0]  ;;  %v2603_v16 = vld [vmem:[#allocation5 + $0x220] sm:$0xf0] }
  0x32   :  { %936 = vmatpush.bf16.msrb.mxu1 %v2382_v50  ;;  %1203 = vmatpush.bf16.msrb.mxu0 %v2386_v51  ;;  %v2334_v50 = vor.u32 %v2569_v33, %v2333_v32  ;;  %v2338_v51 = vor.u32 %v2568_v37, %v2335_v38  ;;  %v2293_v32 = vld [vmem:[#allocation5 + $0xb0] sm:$0xf]  ;;  %v2558_v33 = vld [vmem:[#allocation5 + $0xb8] sm:$0xf0]  ;;  %v2604_v37 = vld [vmem:[#allocation5 + $0x22c] sm:$0xf] }
  0x33   :  { %v2479_v38 = vld [vmem:[#allocation5 + $0x234] sm:$0xf0]  ;;  %v2029_v20 = vld [vmem:[#allocation2 + $0x20] sm:$0xf]  ;;  %v2492_v21 = vld [vmem:[#allocation2 + $0x28] sm:$0xf0] }
  0x34   :  { %v2482_v42 = vor.u32 %v2604_v37, %v2479_v38  ;;  %v2576_v38 = vld [vmem:[#allocation5 + $0x148] sm:$0xf0]  ;;  %s1986_s29 = sshll.u32 %s2847_s2, 4  ;;  %s1988_s5 = sshll.u32 %s3477_s3, 4  ;;  %s1987_s29 = int_to_ptr.vmem [resolvable:$true] %s1986_s29  ;;  %s1989_s5 = int_to_ptr.hbm [resolvable:$true] %s1988_s5 }
  0x35   :  { %1026 = vmatpush.bf16.msrb.mxu2 %v2466_v54  ;;  %1115 = vmatpush.bf16.msrb.mxu3 %v2278_v55  ;;  %v2321_v54 = vld [vmem:[#allocation5 + $0xf0] sm:$0xf]  ;;  %v2566_v55 = vld [vmem:[#allocation5 + $0xf8] sm:$0xf0]  ;;  %s2848_s6 = smov 128   ;;  %s2849_s7 = smov 8  }
  0x36   :  { %937 = vmatpush.bf16.msrb.mxu1 %v2370_v62  ;;  %1204 = vmatpush.bf16.msrb.mxu0 %v2374_v63  ;;  %v2322_v57 = vor.u32 %v2566_v55, %v2321_v54  ;;  %v2218_v62 = vor.u32 %v2538_v59, %v2215_v60  ;;  %v2565_v63 = vld [vmem:[#allocation5 + $0xf4] sm:$0xf]  ;;  %v2093_v54 = vld [vmem:[#allocation2 + $0xa8] sm:$0xf] }
  0x37   :  { %v2509_v55 = vld [vmem:[#allocation2 + $0xb0] sm:$0xf0] }
  0x38   :  { %v2533_v59 = vld [vmem:[#allocation2 + $0x170] sm:$0xf0] }
  0x39   :  { %1027 = vmatpush.bf16.msrb.mxu2 %v2454_v2  ;;  %1116 = vmatpush.bf16.msrb.mxu3 %v2266_v3  ;;  %v2326_v2 = vor.u32 %v2565_v63, %v2323_v0  ;;  %v2563_v3 = vld [vmem:[#allocation5 + $0xe0] sm:$0xf0]  ;;  %v2918_v63 = vor.u32 %v2533_v59, %v2189_v58 }
  0x3a   :  { %938 = vmatpush.bf16.msrb.mxu1 %v2358_v10  ;;  %1205 = vmatpush.bf16.msrb.mxu0 %v2362_v11  ;;  %v2310_v9 = vor.u32 %v2563_v3, %v2309_v1  ;;  %v2311_v10 = vld [vmem:[#allocation5 + $0xe4] sm:$0xf0]  ;;  %v2297_v11 = vld [vmem:[#allocation5 + $0xc0] sm:$0xf]  ;;  %v2487_v0 = vld [vmem:[#allocation2 + $0x4] sm:$0xf] }
  0x3b   :  { %v2314_v14 = vor.u32 %v2562_v8, %v2311_v10  ;;  %v2298_v26 = vor.u32 %v2560_v15, %v2297_v11  ;;  %v2011_v1 = vld [vmem:[#allocation2 + $0xc] sm:$0xf0]  ;;  %v2489_v3 = vld [vmem:[#allocation2 + $0x10] sm:$0xf0]  ;;  %v2377_v8 = vld [vmem:[#allocation5 + $0x158] sm:$0xf] }
  0x3c   :  { %v2924_v4 = vor.u32 %v2487_v0, %v2011_v1  ;;  %v2579_v10 = vld [vmem:[#allocation5 + $0x160] sm:$0xf0]  ;;  %v2601_v11 = vld [vmem:[#allocation5 + $0x214] sm:$0xf]  ;;  %v2473_v15 = vld [vmem:[#allocation5 + $0x218] sm:$0xf] }
  0x3d   :  { %1028 = vmatpush.bf16.msrb.mxu2 %v2442_v18  ;;  %1117 = vmatpush.bf16.msrb.mxu3 %v2254_v19  ;;  %v2033_v18 = vld [vmem:[#allocation2 + $0x30] sm:$0xf]  ;;  %v2494_v19 = vld [vmem:[#allocation2 + $0x38] sm:$0xf0]  ;;  %v2474_v17 = vor.u32 %v2603_v16, %v2473_v15  ;;  %v2499_v0 = vld [vmem:[#allocation2 + $0x64] sm:$0xf] }
  0x3e   :  { %939 = vmatpush.bf16.msrb.mxu1 %v2346_v30  ;;  %1206 = vmatpush.bf16.msrb.mxu0 %v2350_v31  ;;  %v2900_v28 = vor.u32 %v2494_v19, %v2033_v18  ;;  %v2904_v30 = vor.u32 %v2518_v23, %v2129_v22  ;;  %v2906_v31 = vor.u32 %v2530_v25, %v2177_v24  ;;  %v2490_v18 = vld [vmem:[#allocation2 + $0x1c] sm:$0xf]  ;;  %v2023_v19 = vld [vmem:[#allocation2 + $0x24] sm:$0xf0]  ;;  %v2493_v24 = vld [vmem:[#allocation2 + $0x34] sm:$0xf] }
  0x3f   :  { %860 = vmatmul.bf16.gmra.mxu0 %v2888_v39  ;;  %880 = vmatmul.bf16.gmra.mxu1 %v2890_v40  ;;  %v2932_v22 = vor.u32 %v2490_v18, %v2023_v19  ;;  %v2934_v23 = vor.u32 %v2492_v21, %v2029_v20  ;;  %v2035_v25 = vld [vmem:[#allocation2 + $0x3c] sm:$0xf0]  ;;  %v2059_v1 = vld [vmem:[#allocation2 + $0x6c] sm:$0xf0]  ;;  %v2595_v20 = vld [vmem:[#allocation5 + $0x1e4] sm:$0xf] }
  0x40   :  { %900 = vmatmul.bf16.gmra.mxu2 %v2892_v46  ;;  %920 = vmatmul.bf16.gmra.mxu3 %v2894_v47  ;;  %3533 = vst [vmem:[#allocation21_spill] sm:$0xff] %v2904_v30  ;;  %v2443_v21 = vld [vmem:[#allocation5 + $0x1ec] sm:$0xf0] }
  0x41   :  { %1029 = vmatpush.bf16.msrb.mxu2 %v2430_v34  ;;  %1118 = vmatpush.bf16.msrb.mxu3 %v2242_v35  ;;  %3534 = vst [vmem:[#allocation22_spill] sm:$0xff] %v2906_v31  ;;  %v2389_v34 = vld [vmem:[#allocation5 + $0x170] sm:$0xf]  ;;  %v2294_v35 = vor.u32 %v2558_v33, %v2293_v32  ;;  %v2940_v32 = vor.u32 %v2493_v24, %v2035_v25  ;;  %v2449_v24 = vld [vmem:[#allocation5 + $0x1e8] sm:$0xf] }
  0x42   :  { %940 = vmatpush.bf16.msrb.mxu1 %v2334_v50  ;;  %1207 = vmatpush.bf16.msrb.mxu0 %v2338_v51  ;;  %v2390_v41 = vor.u32 %v2582_v36, %v2389_v34  ;;  %v2606_v50 = vld [vmem:[#allocation5 + $0x238] sm:$0xf0]  ;;  %v2269_v34 = vld [vmem:[#allocation5 + $0x80] sm:$0xf]  ;;  %v2446_v25 = vor.u32 %v2595_v20, %v2443_v21  ;;  %v2341_v20 = vld [vmem:[#allocation5 + $0x110] sm:$0xf] }
  0x43   :  { %v2486_v51 = vor.u32 %v2606_v50, %v2485_v45  ;;  %v2365_v36 = vld [vmem:[#allocation5 + $0x140] sm:$0xf]  ;;  %v2455_v45 = vld [vmem:[#allocation5 + $0x204] sm:$0xf0] }
  0x44   :  { %v2461_v50 = vld [vmem:[#allocation5 + $0x200] sm:$0xf] }
  0x45   :  { %1030 = vmatpush.bf16.msrb.mxu2 %v2418_v52  ;;  %1119 = vmatpush.bf16.msrb.mxu3 %v2230_v53  ;;  %v2045_v52 = vld [vmem:[#allocation2 + $0x48] sm:$0xf]  ;;  %v2497_v53 = vld [vmem:[#allocation2 + $0x50] sm:$0xf0] }
  0x46   :  { %941 = vmatpush.bf16.msrb.mxu1 %v2322_v57  ;;  %1208 = vmatpush.bf16.msrb.mxu0 %v2326_v2  ;;  %v2521_v57 = vld [vmem:[#allocation2 + $0x110] sm:$0xf0]  ;;  %v2912_v60 = vor.u32 %v2497_v53, %v2045_v52  ;;  %v2017_v2 = vld [vmem:[#allocation2 + $0x8] sm:$0xf]  ;;  %v2600_v52 = vld [vmem:[#allocation5 + $0x208] sm:$0xf0] }
  0x47   :  { %v2926_v5 = vor.u32 %v2489_v3, %v2017_v2  ;;  %v2462_v53 = vor.u32 %v2600_v52, %v2461_v50  ;;  %v2065_v2 = vld [vmem:[#allocation2 + $0x68] sm:$0xf]  ;;  %v2501_v3 = vld [vmem:[#allocation2 + $0x70] sm:$0xf0] }
  0x49   :  { %1031 = vmatpush.bf16.msrb.mxu2 %v2406_v61  ;;  %1120 = vmatpush.bf16.msrb.mxu3 %v2218_v62  ;;  %v2914_v61 = vor.u32 %v2509_v55, %v2093_v54  ;;  %v2916_v62 = vor.u32 %v2521_v57, %v2141_v56  ;;  %v2496_v54 = vld [vmem:[#allocation2 + $0x4c] sm:$0xf]  ;;  %v2047_v55 = vld [vmem:[#allocation2 + $0x54] sm:$0xf0]  ;;  %v2053_v56 = vld [vmem:[#allocation2 + $0x50] sm:$0xf] }
  0x4a   :  { %942 = vmatpush.bf16.msrb.mxu1 %v2310_v9  ;;  %1209 = vmatpush.bf16.msrb.mxu0 %v2314_v14  ;;  %v2282_v9 = vor.u32 %v2555_v7, %v2281_v6  ;;  %v2498_v57 = vld [vmem:[#allocation2 + $0x58] sm:$0xf0]  ;;  %v2948_v58 = vor.u32 %v2496_v54, %v2047_v55  ;;  %v2956_v6 = vor.u32 %v2499_v0, %v2059_v1  ;;  %v2089_v0 = vld [vmem:[#allocation2 + $0x98] sm:$0xf]  ;;  %v2507_v1 = vld [vmem:[#allocation2 + $0xa0] sm:$0xf0] }
  0x4b   :  { %3535 = vst [vmem:[#allocation23_spill] sm:$0xff] %v2914_v61  ;;  %v2950_v59 = vor.u32 %v2498_v57, %v2053_v56  ;;  %v2505_v56 = vld [vmem:[#allocation2 + $0x94] sm:$0xf]  ;;  %v2083_v57 = vld [vmem:[#allocation2 + $0x9c] sm:$0xf0] }
  0x4c   :  { %3536 = vst [vmem:[#allocation24_spill] sm:$0xff] %v2916_v62 }
  0x4d   :  { %1032 = vmatpush.bf16.msrb.mxu2 %v2394_v12  ;;  %1121 = vmatpush.bf16.msrb.mxu3 %v2206_v13  ;;  %v2467_v12 = vld [vmem:[#allocation5 + $0x21c] sm:$0xf0]  ;;  %v2378_v13 = vor.u32 %v2579_v10, %v2377_v8  ;;  %3537 = vst [vmem:[#allocation25_spill] sm:$0xff] %v2956_v6  ;;  %v2257_v10 = vld [vmem:[#allocation5 + $0x68] sm:$0xf] }
  0x4e   :  { %943 = vmatpush.bf16.msrb.mxu1 %v2298_v26  ;;  %1210 = vmatpush.bf16.msrb.mxu0 %v2302_v27  ;;  %v2470_v14 = vor.u32 %v2601_v11, %v2467_v12  ;;  %v2041_v26 = vld [vmem:[#allocation2 + $0x38] sm:$0xf]  ;;  %v2495_v27 = vld [vmem:[#allocation2 + $0x40] sm:$0xf0]  ;;  %v2549_v11 = vld [vmem:[#allocation5 + $0x70] sm:$0xf0] }
  0x4f   :  { %865 = vmatmul.bf16.gmra.mxu0 %v2900_v28  ;;  %885 = vmatmul.bf16.gmra.mxu1 %v2902_v29  ;;  %v2942_v33 = vor.u32 %v2495_v27, %v2041_v26  ;;  %v2353_v12 = vld [vmem:[#allocation5 + $0x128] sm:$0xf]  ;;  %v2597_v26 = vld [vmem:[#allocation5 + $0x1f0] sm:$0xf0] }
  0x50   :  { %905 = vmatmul.bf16.gmra.mxu2 %v2904_v30  ;;  %925 = vmatmul.bf16.gmra.mxu3 %v2906_v31  ;;  %v2450_v27 = vor.u32 %v2597_v26, %v2449_v24  ;;  %v2570_v24 = vld [vmem:[#allocation5 + $0x118] sm:$0xf0] }
  0x51   :  { %1381 = vmatpush.bf16.msra.mxu2 %v2294_v35  ;;  %1470 = vmatpush.bf16.msra.mxu3 %v2390_v41  ;;  %v2552_v35 = vld [vmem:[#allocation5 + $0x88] sm:$0xf0]  ;;  %v2366_v41 = vor.u32 %v2576_v38, %v2365_v36  ;;  %v2077_v36 = vld [vmem:[#allocation2 + $0x80] sm:$0xf] }
  0x52   :  { %1292 = vmatpush.bf16.msra.mxu1 %v2482_v42  ;;  %1559 = vmatpush.bf16.msra.mxu0 %v2486_v51  ;;  %v2270_v37 = vor.u32 %v2552_v35, %v2269_v34  ;;  %v2598_v42 = vld [vmem:[#allocation5 + $0x1fc] sm:$0xf]  ;;  %v2071_v35 = vld [vmem:[#allocation2 + $0x84] sm:$0xf0] }
  0x53   :  { %v2458_v51 = vor.u32 %v2598_v42, %v2455_v45  ;;  %v2502_v34 = vld [vmem:[#allocation2 + $0x7c] sm:$0xf] }
  0x54   :  { %v2980_v42 = vor.u32 %v2502_v34, %v2071_v35 }
  0x55   :  { %1382 = vmatpush.bf16.msra.mxu2 %v2282_v9  ;;  %1471 = vmatpush.bf16.msra.mxu3 %v2378_v13  ;;  %v2962_v9 = vor.u32 %v2501_v3, %v2065_v2  ;;  %v2258_v13 = vor.u32 %v2549_v11, %v2257_v10  ;;  %v3004_v10 = vor.u32 %v2505_v56, %v2083_v57  ;;  %v2437_v56 = vld [vmem:[#allocation5 + $0x1d0] sm:$0xf] }
  0x56   :  { %1293 = vmatpush.bf16.msra.mxu1 %v2470_v14  ;;  %1560 = vmatpush.bf16.msra.mxu0 %v2474_v17  ;;  %v2573_v14 = vld [vmem:[#allocation5 + $0x130] sm:$0xf0]  ;;  %3541 = vst [vmem:[#allocation29_spill] sm:$0xff] %v2980_v42 }
  0x57   :  { %3538 = vst [vmem:[#allocation26_spill] sm:$0xff] %v2962_v9  ;;  %v2354_v15 = vor.u32 %v2573_v14, %v2353_v12  ;;  %v2245_v14 = vld [vmem:[#allocation5 + $0x50] sm:$0xf] }
  0x58   :  { %3545 = vst [vmem:[#allocation33_spill] sm:$0xff] %v3004_v10 }
  0x59   :  { %1383 = vmatpush.bf16.msra.mxu2 %v2270_v37  ;;  %1472 = vmatpush.bf16.msra.mxu3 %v2366_v41  ;;  %v2504_v37 = vld [vmem:[#allocation2 + $0x88] sm:$0xf0] }
  0x5a   :  { %1294 = vmatpush.bf16.msra.mxu1 %v2458_v51  ;;  %1561 = vmatpush.bf16.msra.mxu0 %v2462_v53  ;;  %v2986_v51 = vor.u32 %v2504_v37, %v2077_v36  ;;  %v2592_v36 = vld [vmem:[#allocation5 + $0x1cc] sm:$0xf]  ;;  %v2431_v37 = vld [vmem:[#allocation5 + $0x1d4] sm:$0xf0] }
  0x5b   :  { %v2434_v57 = vor.u32 %v2592_v36, %v2431_v37 }
  0x5c   :  { %3542 = vst [vmem:[#allocation30_spill] sm:$0xff] %v2986_v51 }
  0x5d   :  { %1384 = vmatpush.bf16.msra.mxu2 %v2258_v13  ;;  %1473 = vmatpush.bf16.msra.mxu3 %v2354_v15  ;;  %v3010_v13 = vor.u32 %v2507_v1, %v2089_v0  ;;  %v2546_v15 = vld [vmem:[#allocation5 + $0x58] sm:$0xf0] }
  0x5e   :  { %1295 = vmatpush.bf16.msra.mxu1 %v2446_v25  ;;  %1562 = vmatpush.bf16.msra.mxu0 %v2450_v27  ;;  %v2246_v21 = vor.u32 %v2546_v15, %v2245_v14  ;;  %v2342_v25 = vor.u32 %v2570_v24, %v2341_v20  ;;  %v2594_v0 = vld [vmem:[#allocation5 + $0x1d8] sm:$0xf0]  ;;  %v2095_v14 = vld [vmem:[#allocation2 + $0xb4] sm:$0xf0]  ;;  %v2101_v15 = vld [vmem:[#allocation2 + $0xb0] sm:$0xf] }
  0x5f   :  { %870 = vmatmul.bf16.gmra.mxu0 %v2912_v60  ;;  %890 = vmatmul.bf16.gmra.mxu1 %v2914_v61  ;;  %3546 = vst [vmem:[#allocation34_spill] sm:$0xff] %v3010_v13  ;;  %v2438_v1 = vor.u32 %v2594_v0, %v2437_v56  ;;  %v2510_v20 = vld [vmem:[#allocation2 + $0xb8] sm:$0xf0]  ;;  %v2107_v0 = vld [vmem:[#allocation2 + $0xcc] sm:$0xf0] }
  0x60   :  { %910 = vmatmul.bf16.gmra.mxu2 %v2916_v62  ;;  %930 = vmatmul.bf16.gmra.mxu3 %v2918_v63 }
  0x61   :  { %1385 = vmatpush.bf16.msra.mxu2 %v2246_v21  ;;  %1474 = vmatpush.bf16.msra.mxu3 %v2342_v25 }
  0x62   :  { %1296 = vmatpush.bf16.msra.mxu1 %v2434_v57  ;;  %1563 = vmatpush.bf16.msra.mxu0 %v2438_v1  ;;  %v2511_v57 = vld [vmem:[#allocation2 + $0xc4] sm:$0xf]  ;;  %v2113_v1 = vld [vmem:[#allocation2 + $0xc8] sm:$0xf] }
  0x6f   :  { %944 = vmatmul.bf16.vlgmr.msrb.gmra.mxu1 %v2924_v4  ;;  %1211 = vmatmul.bf16.vlgmr.msrb.gmra.mxu0 %v2924_v4 }
  0x70   :  { %1033 = vmatmul.bf16.vlgmr.msrb.gmra.mxu2 %v2926_v5  ;;  %1122 = vmatmul.bf16.vlgmr.msrb.gmra.mxu3 %v2876_v43 }
  0x7f   :  { %949 = vmatmul.bf16.gmra.mxu1 %v2932_v22  ;;  %1216 = vmatmul.bf16.gmra.mxu0 %v2932_v22 }
  0x80   :  { %1038 = vmatmul.bf16.gmra.mxu2 %v2934_v23  ;;  %1127 = vmatmul.bf16.gmra.mxu3 %v2888_v39 }
  0x8f   :  { %954 = vmatmul.bf16.gmra.mxu1 %v2940_v32  ;;  %1221 = vmatmul.bf16.gmra.mxu0 %v2940_v32 }
  0x90   :  { %1043 = vmatmul.bf16.gmra.mxu2 %v2942_v33  ;;  %1132 = vmatmul.bf16.gmra.mxu3 %v2900_v28 }
  0x9f   :  { %959 = vmatmul.bf16.gmra.mxu1 %v2948_v58  ;;  %1226 = vmatmul.bf16.gmra.mxu0 %v2948_v58 }
  0xa0   :  { %1048 = vmatmul.bf16.gmra.mxu2 %v2950_v59  ;;  %1137 = vmatmul.bf16.gmra.mxu3 %v2912_v60 }
  0xac   :  { %v2958_v7 = vpop.f32.mrf.mxu0  ;;  %v2960_v8 = vpop.f32.mrf.mxu1 }
  0xaf   :  { %964 = vmatmul.bf16.gmra.mxu1 %v2956_v6  ;;  %1231 = vmatmul.bf16.gmra.mxu0 %v2956_v6  ;;  %v2591_v6 = vld [vmem:[#allocation5 + $0x1c0] sm:$0xf0] }
  0xb0   :  { %1053 = vmatmul.bf16.gmra.mxu2 %v2962_v9  ;;  %1142 = vmatmul.bf16.gmra.mxu3 %v2878_v44  ;;  %v2514_v44 = vld [vmem:[#allocation2 + $0xdc] sm:$0xf]  ;;  %v2119_v9 = vld [vmem:[#allocation2 + $0xe4] sm:$0xf0] }
  0xb3   :  { %v2968_v16 = vpop.f32.mrf.mxu2  ;;  %v2970_v17 = vpop.f32.mrf.mxu3 }
  0xb4   :  { %3539 = vst [vmem:[#allocation27_spill] sm:$0xff] %v2970_v17  ;;  %v2972_v18 = vpop.f32.mrf.mxu0  ;;  %v2974_v19 = vpop.f32.mrf.mxu1  ;;  %v2425_v17 = vld [vmem:[#allocation5 + $0x1b8] sm:$0xf] }
  0xbb   :  { %v2976_v38 = vpop.f32.mrf.mxu2  ;;  %v2978_v41 = vpop.f32.mrf.mxu3 }
  0xbc   :  { %3540 = vst [vmem:[#allocation28_spill] sm:$0xff] %v2978_v41  ;;  %v2982_v45 = vpop.f32.mrf.mxu0  ;;  %v2984_v50 = vpop.f32.mrf.mxu1  ;;  %v2589_v41 = vld [vmem:[#allocation5 + $0x1b4] sm:$0xf] }
  0xbf   :  { %969 = vmatmul.bf16.gmra.mxu1 %v2980_v42  ;;  %1236 = vmatmul.bf16.gmra.mxu0 %v2980_v42 }
  0xc0   :  { %1058 = vmatmul.bf16.gmra.mxu2 %v2986_v51  ;;  %1147 = vmatmul.bf16.gmra.mxu3 %v2890_v40  ;;  %v2567_v40 = vld [vmem:[#allocation5 + $0x100] sm:$0xf0] }
  0xc3   :  { %v2992_v52 = vpop.f32.mrf.mxu2  ;;  %v2994_v53 = vpop.f32.mrf.mxu3 }
  0xc4   :  { %3543 = vst [vmem:[#allocation31_spill] sm:$0xff] %v2994_v53  ;;  %v2996_v54 = vpop.f32.mrf.mxu0  ;;  %v2998_v55 = vpop.f32.mrf.mxu1  ;;  %v2329_v53 = vld [vmem:[#allocation5 + $0xf8] sm:$0xf] }
  0xcb   :  { %v3000_v2 = vpop.f32.mrf.mxu2  ;;  %v3002_v3 = vpop.f32.mrf.mxu3 }
  0xcc   :  { %3544 = vst [vmem:[#allocation32_spill] sm:$0xff] %v3002_v3  ;;  %v3006_v11 = vpop.f32.mrf.mxu0  ;;  %v3008_v12 = vpop.f32.mrf.mxu1  ;;  %v2543_v3 = vld [vmem:[#allocation5 + $0x40] sm:$0xf0] }
  0xcf   :  { %974 = vmatmul.bf16.gmra.mxu1 %v3004_v10  ;;  %1241 = vmatmul.bf16.gmra.mxu0 %v3004_v10  ;;  %v2508_v10 = vld [vmem:[#allocation2 + $0xac] sm:$0xf] }
  0xd0   :  { %1063 = vmatmul.bf16.gmra.mxu2 %v3010_v13  ;;  %1152 = vmatmul.bf16.gmra.mxu3 %v2902_v29  ;;  %v3034_v13 = vor.u32 %v2510_v20, %v2101_v15 }
  0xd2   :  { %3550 = vst [vmem:[#allocation38_spill] sm:$0xff] %v3034_v13 }
  0xd3   :  { %v3016_v26 = vpop.f32.mrf.mxu2  ;;  %v3018_v27 = vpop.f32.mrf.mxu3 }
  0xd4   :  { %3547 = vst [vmem:[#allocation35_spill] sm:$0xff] %v3018_v27  ;;  %v3020_v34 = vpop.f32.mrf.mxu0  ;;  %v3022_v35 = vpop.f32.mrf.mxu1  ;;  %v3028_v27 = vor.u32 %v2508_v10, %v2095_v14  ;;  %v2513_v14 = vld [vmem:[#allocation2 + $0xd0] sm:$0xf0] }
  0xd6   :  { %3549 = vst [vmem:[#allocation37_spill] sm:$0xff] %v3028_v27 }
  0xdb   :  { %v3024_v24 = vpop.f32.mrf.mxu2  ;;  %v3026_v21 = vpop.f32.mrf.mxu3 }
  0xdc   :  { %3548 = vst [vmem:[#allocation36_spill] sm:$0xff] %v3026_v21  ;;  %v3030_v29 = vpop.f32.mrf.mxu0  ;;  %v3032_v25 = vpop.f32.mrf.mxu1  ;;  %v3054_v21 = vor.u32 %v2513_v14, %v2113_v1 }
  0xde   :  { %3554 = vst [vmem:[#allocation42_spill] sm:$0xff] %v3054_v21 }
  0xdf   :  { %979 = vmatmul.bf16.gmra.mxu1 %v3028_v27  ;;  %1246 = vmatmul.bf16.gmra.mxu0 %v3028_v27  ;;  %v3052_v27 = vor.u32 %v2511_v57, %v2107_v0 }
  0xe0   :  { %1068 = vmatmul.bf16.gmra.mxu2 %v3034_v13  ;;  %1157 = vmatmul.bf16.gmra.mxu3 %v2914_v61 }
  0xe1   :  { %3553 = vst [vmem:[#allocation41_spill] sm:$0xff] %v3052_v27 }
  0xe3   :  { %v3040_v36 = vpop.f32.mrf.mxu2  ;;  %v3042_v37 = vpop.f32.mrf.mxu3 }
  0xe4   :  { %3551 = vst [vmem:[#allocation39_spill] sm:$0xff] %v3042_v37  ;;  %v3044_v10 = vpop.f32.mrf.mxu0  ;;  %v3046_v56 = vpop.f32.mrf.mxu1  ;;  %v2233_v37 = vld [vmem:[#allocation5 + $0x38] sm:$0xf] }
  0xe5   :  { %v2234_v42 = vor.u32 %v2543_v3, %v2233_v37  ;;  %v2125_v3 = vld [vmem:[#allocation2 + $0xe0] sm:$0xf]  ;;  %v2516_v37 = vld [vmem:[#allocation2 + $0xe8] sm:$0xf0] }
  0xe7   :  { %1386 = vmatpush.bf16.msra.mxu2 %v2234_v42 }
  0xeb   :  { %v3048_v15 = vpop.f32.mrf.mxu2  ;;  %v3050_v20 = vpop.f32.mrf.mxu3 }
  0xec   :  { %3552 = vst [vmem:[#allocation40_spill] sm:$0xff] %v3050_v20  ;;  %v945_v13 = vpop.f32.mrf.mxu1  ;;  %v1212_v61 = vpop.f32.mrf.mxu0  ;;  %v2330_v20 = vor.u32 %v2567_v40, %v2329_v53 }
  0xed   :  { %v946_v40 = vadd.f32 %v945_v13, %v2958_v7 }
  0xee   :  { %1475 = vmatpush.bf16.msra.mxu3 %v2330_v20 }
  0xef   :  { %984 = vmatmul.bf16.gmra.mxu1 %v3052_v27  ;;  %1251 = vmatmul.bf16.gmra.mxu0 %v3052_v27  ;;  %v2419_v27 = vld [vmem:[#allocation5 + $0x1bc] sm:$0xf0] }
  0xf0   :  { %1073 = vmatmul.bf16.gmra.mxu2 %v3054_v21  ;;  %1162 = vmatmul.bf16.gmra.mxu3 %v2880_v48  ;;  %v2422_v21 = vor.u32 %v2589_v41, %v2419_v27  ;;  %v2426_v48 = vor.u32 %v2591_v6, %v2425_v17  ;;  %v3072_v27 = vor.u32 %v2516_v37, %v2125_v3 }
  0xf2   :  { %1297 = vmatpush.bf16.msra.mxu1 %v2422_v21  ;;  %1564 = vmatpush.bf16.msra.mxu0 %v2426_v48  ;;  %v2517_v21 = vld [vmem:[#allocation2 + $0xf4] sm:$0xf] }
  0xf3   :  { %v1034_v57 = vpop.f32.mrf.mxu2  ;;  %v1123_v0 = vpop.f32.mrf.mxu3 }
  0xf4   :  { %v3060_v51 = vadd.f32 %v1212_v61, %v1123_v0  ;;  %v947_v1 = vpop.f32.mrf.mxu1  ;;  %v1214_v14 = vpop.f32.mrf.mxu0  ;;  %v3064_v0 = vor.u32 %v2514_v44, %v2119_v9  ;;  %v3066_v20 = vadd.f32 %v1034_v57, %v946_v40  ;;  %v2131_v57 = vld [vmem:[#allocation2 + $0xfc] sm:$0xf0] }
  0xf5   :  { %v948_v61 = vadd.f32 %v947_v1, %v2972_v18  ;;  %v2137_v1 = vld [vmem:[#allocation2 + $0xf8] sm:$0xf] }
  0xf6   :  { %3555 = vst [vmem:[#allocation43_spill] sm:$0xff] %v3060_v51 }
  0xf7   :  { %3556 = vst [vmem:[#allocation44_spill] sm:$0xff] %v3064_v0 }
  0xfb   :  { %v1036_v42 = vpop.f32.mrf.mxu2  ;;  %v1125_v53 = vpop.f32.mrf.mxu3 }
  0xfc   :  { %v3068_v51 = vadd.f32 %v1036_v42, %v948_v61  ;;  %v3070_v41 = vadd.f32 %v1214_v14, %v1125_v53  ;;  %v950_v6 = vpop.f32.mrf.mxu1  ;;  %v1217_v17 = vpop.f32.mrf.mxu0  ;;  %v2519_v14 = vld [vmem:[#allocation2 + $0x100] sm:$0xf0]  ;;  %v3084_v42 = vor.u32 %v2517_v21, %v2131_v57 }
  0xfd   :  { %v951_v3 = vadd.f32 %v950_v6, %v2982_v45  ;;  %v2221_v45 = vld [vmem:[#allocation5 + $0x20] sm:$0xf] }
  0xfe   :  { %v2610_v48 = vpack.c.bf16 %v3068_v51, %v3066_v20  ;;  %3558 = vst [vmem:[#allocation46_spill] sm:$0xff] %v3084_v42 }
  0xff   :  { %989 = vmatmul.bf16.gmra.mxu1 %v3064_v0  ;;  %1256 = vmatmul.bf16.gmra.mxu0 %v3064_v0  ;;  %v3092_v0 = vor.u32 %v2519_v14, %v2137_v1 }
 0x100   :  { %2611 = vst [vmem:[#allocation7] sm:$0xff] %v2610_v48   ;;  %1078 = vmatmul.bf16.gmra.mxu2 %v3072_v27  ;;  %1167 = vmatmul.bf16.gmra.mxu3 %v2892_v46 }
 0x101   :  { %3560 = vst [vmem:[#allocation48_spill] sm:$0xff] %v3092_v0 }
 0x103   :  { %v1039_v44 = vpop.f32.mrf.mxu2  ;;  %v1128_v7 = vpop.f32.mrf.mxu3 }
 0x104   :  { %v3080_v9 = vadd.f32 %v1217_v17, %v1128_v7  ;;  %v952_v18 = vpop.f32.mrf.mxu1  ;;  %v1219_v13 = vpop.f32.mrf.mxu0  ;;  %v3086_v53 = vadd.f32 %v1039_v44, %v951_v3  ;;  %v2317_v44 = vld [vmem:[#allocation5 + $0xe0] sm:$0xf] }
 0x105   :  { %v953_v37 = vadd.f32 %v952_v18, %v2996_v54  ;;  %v2540_v54 = vld [vmem:[#allocation5 + $0x28] sm:$0xf0] }
 0x106   :  { %3557 = vst [vmem:[#allocation45_spill] sm:$0xff] %v3080_v9  ;;  %v2222_v6 = vor.u32 %v2540_v54, %v2221_v45  ;;  %v2564_v18 = vld [vmem:[#allocation5 + $0xe8] sm:$0xf0]  ;;  %v2149_v45 = vld [vmem:[#allocation2 + $0x110] sm:$0xf] }
 0x107   :  { %v2522_v54 = vld [vmem:[#allocation2 + $0x118] sm:$0xf0] }
 0x108   :  { %1387 = vmatpush.bf16.msra.mxu2 %v2222_v6 }
 0x10b   :  { %v1041_v40 = vpop.f32.mrf.mxu2  ;;  %v1130_v61 = vpop.f32.mrf.mxu3 }
 0x10c   :  { %v3088_v48 = vadd.f32 %v1041_v40, %v953_v37  ;;  %v3090_v17 = vadd.f32 %v1219_v13, %v1130_v61  ;;  %v955_v7 = vpop.f32.mrf.mxu1  ;;  %v1222_v9 = vpop.f32.mrf.mxu0  ;;  %v2318_v13 = vor.u32 %v2564_v18, %v2317_v44  ;;  %v2586_v37 = vld [vmem:[#allocation5 + $0x19c] sm:$0xf]  ;;  %v2413_v40 = vld [vmem:[#allocation5 + $0x1a0] sm:$0xf] }
 0x10d   :  { %v956_v44 = vadd.f32 %v955_v7, %v3006_v11 }
 0x10e   :  { %3559 = vst [vmem:[#allocation47_spill] sm:$0xff] %v3088_v48  ;;  %v2615_v46 = vpack.c.bf16 %v3088_v48, %v3086_v53  ;;  %1476 = vmatpush.bf16.msra.mxu3 %v2318_v13  ;;  %v2143_v48 = vld [vmem:[#allocation2 + $0x114] sm:$0xf0] }
 0x10f   :  { %994 = vmatmul.bf16.gmra.mxu1 %v3084_v42  ;;  %1261 = vmatmul.bf16.gmra.mxu0 %v3084_v42  ;;  %v2588_v42 = vld [vmem:[#allocation5 + $0x1a8] sm:$0xf0] }
 0x110   :  { %2687 = vst [vmem:[#allocation7 + $0x8] sm:$0xff] %v2615_v46   ;;  %1083 = vmatmul.bf16.gmra.mxu2 %v3092_v0  ;;  %1172 = vmatmul.bf16.gmra.mxu3 %v2904_v30  ;;  %v2407_v46 = vld [vmem:[#allocation5 + $0x1a4] sm:$0xf0]  ;;  %v2414_v30 = vor.u32 %v2588_v42, %v2413_v40  ;;  %v2520_v0 = vld [vmem:[#allocation2 + $0x10c] sm:$0xf]  ;;  %v3112_v40 = vor.u32 %v2522_v54, %v2149_v45 }
 0x111   :  { %v2410_v61 = vor.u32 %v2586_v37, %v2407_v46 }
 0x112   :  { %1565 = vmatpush.bf16.msra.mxu0 %v2414_v30 }
 0x113   :  { %v1044_v21 = vpop.f32.mrf.mxu2  ;;  %v1133_v57 = vpop.f32.mrf.mxu3  ;;  %1298 = vmatpush.bf16.msra.mxu1 %v2410_v61  ;;  %v2525_v61 = vld [vmem:[#allocation2 + $0x130] sm:$0xf0] }
 0x114   :  { %v3100_v1 = vadd.f32 %v1222_v9, %v1133_v57  ;;  %v957_v14 = vpop.f32.mrf.mxu1  ;;  %v1224_v3 = vpop.f32.mrf.mxu0  ;;  %v3104_v57 = vor.u32 %v2520_v0, %v2143_v48  ;;  %v3106_v13 = vadd.f32 %v1044_v21, %v956_v44  ;;  %v2523_v21 = vld [vmem:[#allocation2 + $0x124] sm:$0xf] }
 0x115   :  { %v958_v9 = vadd.f32 %v957_v14, %v3020_v34  ;;  %v2155_v14 = vld [vmem:[#allocation2 + $0x12c] sm:$0xf0] }
 0x116   :  { %3561 = vst [vmem:[#allocation49_spill] sm:$0xff] %v3100_v1 }
 0x117   :  { %3562 = vst [vmem:[#allocation50_spill] sm:$0xff] %v3104_v57 }
 0x11b   :  { %v1046_v6 = vpop.f32.mrf.mxu2  ;;  %v1135_v18 = vpop.f32.mrf.mxu3 }
 0x11c   :  { %v3108_v1 = vadd.f32 %v1046_v6, %v958_v9  ;;  %v3110_v37 = vadd.f32 %v1224_v3, %v1135_v18  ;;  %v960_v42 = vpop.f32.mrf.mxu1  ;;  %v1227_v46 = vpop.f32.mrf.mxu0  ;;  %v2161_v3 = vld [vmem:[#allocation2 + $0x128] sm:$0xf]  ;;  %v3124_v6 = vor.u32 %v2523_v21, %v2155_v14 }
 0x11d   :  { %v961_v45 = vadd.f32 %v960_v42, %v3030_v29  ;;  %v2209_v29 = vld [vmem:[#allocation5 + $0x8] sm:$0xf] }
 0x11e   :  { %v2620_v30 = vpack.c.bf16 %v3108_v1, %v3106_v13  ;;  %3564 = vst [vmem:[#allocation52_spill] sm:$0xff] %v3124_v6 }
 0x11f   :  { %999 = vmatmul.bf16.gmra.mxu1 %v3104_v57  ;;  %1266 = vmatmul.bf16.gmra.mxu0 %v3104_v57  ;;  %v3132_v57 = vor.u32 %v2525_v61, %v2161_v3 }
 0x120   :  { %2688 = vst [vmem:[#allocation7 + $0x10] sm:$0xff] %v2620_v30   ;;  %1088 = vmatmul.bf16.gmra.mxu2 %v3112_v40  ;;  %1177 = vmatmul.bf16.gmra.mxu3 %v2916_v62 }
 0x121   :  { %3566 = vst [vmem:[#allocation54_spill] sm:$0xff] %v3132_v57 }
 0x123   :  { %v1049_v11 = vpop.f32.mrf.mxu2  ;;  %v1138_v34 = vpop.f32.mrf.mxu3 }
 0x124   :  { %v3120_v0 = vadd.f32 %v1227_v46, %v1138_v34  ;;  %v962_v48 = vpop.f32.mrf.mxu1  ;;  %v1229_v7 = vpop.f32.mrf.mxu0  ;;  %v3126_v18 = vadd.f32 %v1049_v11, %v961_v45  ;;  %v2305_v11 = vld [vmem:[#allocation5 + $0xc8] sm:$0xf] }
 0x125   :  { %v963_v54 = vadd.f32 %v962_v48, %v3044_v10  ;;  %v2537_v10 = vld [vmem:[#allocation5 + $0x10] sm:$0xf0] }
 0x126   :  { %3563 = vst [vmem:[#allocation51_spill] sm:$0xff] %v3120_v0  ;;  %v2210_v42 = vor.u32 %v2537_v10, %v2209_v29  ;;  %v2561_v48 = vld [vmem:[#allocation5 + $0xd0] sm:$0xf0]  ;;  %v2173_v29 = vld [vmem:[#allocation2 + $0x140] sm:$0xf] }
 0x127   :  { %v2528_v10 = vld [vmem:[#allocation2 + $0x148] sm:$0xf0] }
 0x128   :  { %1388 = vmatpush.bf16.msra.mxu2 %v2210_v42 }
 0x12b   :  { %v1051_v44 = vpop.f32.mrf.mxu2  ;;  %v1140_v9 = vpop.f32.mrf.mxu3 }
 0x12c   :  { %v3128_v30 = vadd.f32 %v1051_v44, %v963_v54  ;;  %v3130_v46 = vadd.f32 %v1229_v7, %v1140_v9  ;;  %v965_v34 = vpop.f32.mrf.mxu1  ;;  %v1232_v0 = vpop.f32.mrf.mxu0  ;;  %v2306_v7 = vor.u32 %v2561_v48, %v2305_v11  ;;  %v2583_v54 = vld [vmem:[#allocation5 + $0x184] sm:$0xf]  ;;  %v2401_v44 = vld [vmem:[#allocation5 + $0x188] sm:$0xf] }
 0x12d   :  { %v966_v11 = vadd.f32 %v965_v34, %v2960_v8 }
 0x12e   :  { %3565 = vst [vmem:[#allocation53_spill] sm:$0xff] %v3128_v30  ;;  %v2625_v62 = vpack.c.bf16 %v3128_v30, %v3126_v18  ;;  %1477 = vmatpush.bf16.msra.mxu3 %v2306_v7  ;;  %v2167_v30 = vld [vmem:[#allocation2 + $0x144] sm:$0xf0] }
 0x12f   :  { %1004 = vmatmul.bf16.gmra.mxu1 %v3124_v6  ;;  %1271 = vmatmul.bf16.gmra.mxu0 %v3124_v6  ;;  %v2585_v6 = vld [vmem:[#allocation5 + $0x190] sm:$0xf0] }
 0x130   :  { %2689 = vst [vmem:[#allocation7 + $0x18] sm:$0xff] %v2625_v62   ;;  %1093 = vmatmul.bf16.gmra.mxu2 %v3132_v57  ;;  %1182 = vmatmul.bf16.gmra.mxu3 %v2882_v49  ;;  %v2395_v62 = vld [vmem:[#allocation5 + $0x18c] sm:$0xf0]  ;;  %v2402_v49 = vor.u32 %v2585_v6, %v2401_v44  ;;  %v2526_v57 = vld [vmem:[#allocation2 + $0x13c] sm:$0xf]  ;;  %v3152_v44 = vor.u32 %v2528_v10, %v2173_v29 }
 0x131   :  { %v2398_v9 = vor.u32 %v2583_v54, %v2395_v62 }
 0x132   :  { %1566 = vmatpush.bf16.msra.mxu0 %v2402_v49 }
 0x133   :  { %v1054_v21 = vpop.f32.mrf.mxu2  ;;  %v1143_v14 = vpop.f32.mrf.mxu3  ;;  %1299 = vmatpush.bf16.msra.mxu1 %v2398_v9  ;;  %v2531_v9 = vld [vmem:[#allocation2 + $0x160] sm:$0xf0] }
 0x134   :  { %v3140_v3 = vadd.f32 %v1232_v0, %v1143_v14  ;;  %v967_v61 = vpop.f32.mrf.mxu1  ;;  %v1234_v45 = vpop.f32.mrf.mxu0  ;;  %v3144_v14 = vor.u32 %v2526_v57, %v2167_v30  ;;  %v3146_v7 = vadd.f32 %v1054_v21, %v966_v11  ;;  %v2529_v21 = vld [vmem:[#allocation2 + $0x154] sm:$0xf] }
 0x135   :  { %v968_v0 = vadd.f32 %v967_v61, %v2974_v19  ;;  %v2179_v61 = vld [vmem:[#allocation2 + $0x15c] sm:$0xf0] }
 0x136   :  { %3567 = vst [vmem:[#allocation55_spill] sm:$0xff] %v3140_v3 }
 0x137   :  { %3568 = vst [vmem:[#allocation56_spill] sm:$0xff] %v3144_v14 }
 0x13b   :  { %v1056_v42 = vpop.f32.mrf.mxu2  ;;  %v1145_v48 = vpop.f32.mrf.mxu3 }
 0x13c   :  { %v3148_v3 = vadd.f32 %v1056_v42, %v968_v0  ;;  %v3150_v54 = vadd.f32 %v1234_v45, %v1145_v48  ;;  %v970_v6 = vpop.f32.mrf.mxu1  ;;  %v1237_v62 = vpop.f32.mrf.mxu0  ;;  %v2185_v45 = vld [vmem:[#allocation2 + $0x158] sm:$0xf]  ;;  %v3164_v42 = vor.u32 %v2529_v21, %v2179_v61  ;;  %v2197_v61 = vld [vmem:[#allocation2 + $0x170] sm:$0xf] }
 0x13d   :  { %v971_v29 = vadd.f32 %v970_v6, %v2984_v50  ;;  %v2191_v21 = vld [vmem:[#allocation2 + $0x174] sm:$0xf0] }
 0x13e   :  { %v2630_v49 = vpack.c.bf16 %v3148_v3, %v3146_v7  ;;  %3570 = vst [vmem:[#allocation58_spill] sm:$0xff] %v3164_v42 }
 0x13f   :  { %1009 = vmatmul.bf16.gmra.mxu1 %v3144_v14  ;;  %1276 = vmatmul.bf16.gmra.mxu0 %v3144_v14  ;;  %v3172_v14 = vor.u32 %v2531_v9, %v2185_v45  ;;  %v2534_v45 = vld [vmem:[#allocation2 + $0x178] sm:$0xf0] }
 0x140   :  { %2690 = vst [vmem:[#allocation7 + $0x20] sm:$0xff] %v2630_v49   ;;  %1098 = vmatmul.bf16.gmra.mxu2 %v3152_v44  ;;  %1187 = vmatmul.bf16.gmra.mxu3 %v2894_v47 }
 0x141   :  { %3571 = vst [vmem:[#allocation59_spill] sm:$0xff] %v3172_v14 }
 0x143   :  { %v1059_v8 = vpop.f32.mrf.mxu2  ;;  %v1148_v19 = vpop.f32.mrf.mxu3 }
 0x144   :  { %v3160_v57 = vadd.f32 %v1237_v62, %v1148_v19  ;;  %v972_v30 = vpop.f32.mrf.mxu1  ;;  %v1239_v34 = vpop.f32.mrf.mxu0  ;;  %v3166_v48 = vadd.f32 %v1059_v8, %v971_v29 }
 0x145   :  { %v973_v10 = vadd.f32 %v972_v30, %v2998_v55 }
 0x146   :  { %3569 = vst [vmem:[#allocation57_spill] sm:$0xff] %v3160_v57 }
 0x14b   :  { %v1061_v11 = vpop.f32.mrf.mxu2  ;;  %v1150_v0 = vpop.f32.mrf.mxu3 }
 0x14c   :  { %v3168_v49 = vadd.f32 %v1061_v11, %v973_v10  ;;  %v3170_v62 = vadd.f32 %v1239_v34, %v1150_v0  ;;  %v975_v19 = vpop.f32.mrf.mxu1  ;;  %v1242_v57 = vpop.f32.mrf.mxu0  ;;  %v2532_v34 = vld [vmem:[#allocation2 + $0x16c] sm:$0xf] }
 0x14d   :  { %v976_v9 = vadd.f32 %v975_v19, %v3008_v12  ;;  %v3184_v11 = vor.u32 %v2532_v34, %v2191_v21 }
 0x14e   :  { %v2635_v47 = vpack.c.bf16 %v3168_v49, %v3166_v48 }
 0x14f   :  { %1014 = vmatmul.bf16.gmra.mxu1 %v3164_v42  ;;  %1281 = vmatmul.bf16.gmra.mxu0 %v3164_v42 }
 0x150   :  { %2691 = vst [vmem:[#allocation7 + $0x28] sm:$0xff] %v2635_v47   ;;  %1103 = vmatmul.bf16.gmra.mxu2 %v3172_v14  ;;  %1192 = vmatmul.bf16.gmra.mxu3 %v2906_v31  ;;  %v3192_v31 = vor.u32 %v2534_v45, %v2197_v61 }
 0x153   :  { %v1064_v50 = vpop.f32.mrf.mxu2  ;;  %v1153_v55 = vpop.f32.mrf.mxu3 }
 0x154   :  { %v3180_v6 = vadd.f32 %v1242_v57, %v1153_v55  ;;  %v977_v8 = vpop.f32.mrf.mxu1  ;;  %v1244_v30 = vpop.f32.mrf.mxu0  ;;  %v3186_v0 = vadd.f32 %v1064_v50, %v976_v9 }
 0x155   :  { %v978_v29 = vadd.f32 %v977_v8, %v3022_v35 }
 0x156   :  { %3572 = vst [vmem:[#allocation60_spill] sm:$0xff] %v3180_v6 }
 0x15b   :  { %v1066_v10 = vpop.f32.mrf.mxu2  ;;  %v1155_v47 = vpop.f32.mrf.mxu3 }
 0x15c   :  { %v3188_v42 = vadd.f32 %v1066_v10, %v978_v29  ;;  %v3190_v57 = vadd.f32 %v1244_v30, %v1155_v47  ;;  %v980_v55 = vpop.f32.mrf.mxu1  ;;  %v1247_v6 = vpop.f32.mrf.mxu0 }
 0x15d   :  { %v981_v30 = vadd.f32 %v980_v55, %v3032_v25 }
 0x15e   :  { %v2640_v14 = vpack.c.bf16 %v3188_v42, %v3186_v0 }
 0x15f   :  { %1019 = vmatmul.bf16.gmra.mxu1 %v3184_v11  ;;  %1286 = vmatmul.bf16.gmra.mxu0 %v3184_v11 }
 0x160   :  { %2692 = vst [vmem:[#allocation7 + $0x30] sm:$0xff] %v2640_v14   ;;  %1108 = vmatmul.bf16.gmra.mxu2 %v3192_v31  ;;  %1197 = vmatmul.bf16.gmra.mxu3 %v2918_v63 }
 0x163   :  { %v1069_v12 = vpop.f32.mrf.mxu2  ;;  %v1158_v35 = vpop.f32.mrf.mxu3 }
 0x164   :  { %v3200_v19 = vadd.f32 %v1247_v6, %v1158_v35  ;;  %v982_v50 = vpop.f32.mrf.mxu1  ;;  %v1249_v8 = vpop.f32.mrf.mxu0  ;;  %v3204_v45 = vadd.f32 %v1069_v12, %v981_v30 }
 0x165   :  { %v983_v34 = vadd.f32 %v982_v50, %v3046_v56 }
 0x16b   :  { %v1071_v21 = vpop.f32.mrf.mxu2  ;;  %v1160_v61 = vpop.f32.mrf.mxu3 }
 0x16c   :  { %v3206_v9 = vadd.f32 %v1071_v21, %v983_v34  ;;  %v3208_v14 = vadd.f32 %v1249_v8, %v1160_v61  ;;  %v985_v29 = vpop.f32.mrf.mxu1  ;;  %v1252_v10 = vpop.f32.mrf.mxu0 }
 0x16d   :  { %v986_v35 = vadd.f32 %v985_v29, %v2968_v16 }
 0x16e   :  { %v2645_v6 = vpack.c.bf16 %v3206_v9, %v3204_v45 }
 0x16f   :  { %1300 = vmatmul.bf16.vlgmr.msra.gmra.mxu1 %v2926_v5  ;;  %1567 = vmatmul.bf16.vlgmr.msra.gmra.mxu0 %v2926_v5 }
 0x170   :  { %2693 = vst [vmem:[#allocation7 + $0x38] sm:$0xff] %v2645_v6   ;;  %1389 = vmatmul.bf16.vlgmr.msra.gmra.mxu2 %v2876_v43  ;;  %1478 = vmatmul.bf16.vlgmr.msra.gmra.mxu3 %v2924_v4 }
 0x173   :  { %v1074_v25 = vpop.f32.mrf.mxu2  ;;  %v1163_v56 = vpop.f32.mrf.mxu3 }
 0x174   :  { %v3216_v47 = vadd.f32 %v1252_v10, %v1163_v56  ;;  %v987_v55 = vpop.f32.mrf.mxu1  ;;  %v1254_v12 = vpop.f32.mrf.mxu0  ;;  %v3220_v34 = vadd.f32 %v1074_v25, %v986_v35 }
 0x175   :  { %v988_v50 = vadd.f32 %v987_v55, %v2976_v38 }
 0x17b   :  { %v1076_v8 = vpop.f32.mrf.mxu2  ;;  %v1165_v30 = vpop.f32.mrf.mxu3 }
 0x17c   :  { %v3222_v5 = vadd.f32 %v1076_v8, %v988_v50  ;;  %v3224_v21 = vadd.f32 %v1254_v12, %v1165_v30  ;;  %v990_v43 = vpop.f32.mrf.mxu1  ;;  %v1257_v4 = vpop.f32.mrf.mxu0 }
 0x17d   :  { %v991_v25 = vadd.f32 %v990_v43, %v2992_v52 }
 0x17e   :  { %v2650_v61 = vpack.c.bf16 %v3222_v5, %v3220_v34 }
 0x17f   :  { %1305 = vmatmul.bf16.gmra.mxu1 %v2934_v23  ;;  %1572 = vmatmul.bf16.gmra.mxu0 %v2934_v23 }
 0x180   :  { %2694 = vst [vmem:[#allocation7 + $0x40] sm:$0xff] %v2650_v61   ;;  %1394 = vmatmul.bf16.gmra.mxu2 %v2888_v39  ;;  %1483 = vmatmul.bf16.gmra.mxu3 %v2932_v22 }
 0x183   :  { %v1079_v16 = vpop.f32.mrf.mxu2  ;;  %v1168_v38 = vpop.f32.mrf.mxu3 }
 0x184   :  { %v3232_v29 = vadd.f32 %v1257_v4, %v1168_v38  ;;  %v992_v10 = vpop.f32.mrf.mxu1  ;;  %v1259_v6 = vpop.f32.mrf.mxu0  ;;  %v3236_v35 = vadd.f32 %v1079_v16, %v991_v25 }
 0x185   :  { %v993_v56 = vadd.f32 %v992_v10, %v3000_v2 }
 0x18b   :  { %v1081_v55 = vpop.f32.mrf.mxu2  ;;  %v1170_v12 = vpop.f32.mrf.mxu3 }
 0x18c   :  { %v3238_v23 = vadd.f32 %v1081_v55, %v993_v56  ;;  %v3240_v50 = vadd.f32 %v1259_v6, %v1170_v12  ;;  %v995_v39 = vpop.f32.mrf.mxu1  ;;  %v1262_v22 = vpop.f32.mrf.mxu0 }
 0x18d   :  { %v996_v61 = vadd.f32 %v995_v39, %v3016_v26 }
 0x18e   :  { %v2655_v8 = vpack.c.bf16 %v3238_v23, %v3236_v35 }
 0x18f   :  { %1310 = vmatmul.bf16.gmra.mxu1 %v2942_v33  ;;  %1577 = vmatmul.bf16.gmra.mxu0 %v2942_v33 }
 0x190   :  { %2695 = vst [vmem:[#allocation7 + $0x48] sm:$0xff] %v2655_v8   ;;  %1399 = vmatmul.bf16.gmra.mxu2 %v2900_v28  ;;  %1488 = vmatmul.bf16.gmra.mxu3 %v2940_v32 }
 0x193   :  { %v1084_v52 = vpop.f32.mrf.mxu2  ;;  %v1173_v2 = vpop.f32.mrf.mxu3 }
 0x194   :  { %v3248_v30 = vadd.f32 %v1262_v22, %v1173_v2  ;;  %v997_v43 = vpop.f32.mrf.mxu1  ;;  %v1264_v4 = vpop.f32.mrf.mxu0  ;;  %v3252_v6 = vadd.f32 %v1084_v52, %v996_v61 }
 0x195   :  { %v998_v16 = vadd.f32 %v997_v43, %v3024_v24 }
 0x19b   :  { %v1086_v38 = vpop.f32.mrf.mxu2  ;;  %v1175_v10 = vpop.f32.mrf.mxu3 }
 0x19c   :  { %v3254_v33 = vadd.f32 %v1086_v38, %v998_v16  ;;  %v3256_v25 = vadd.f32 %v1264_v4, %v1175_v10  ;;  %v1000_v28 = vpop.f32.mrf.mxu1  ;;  %v1267_v32 = vpop.f32.mrf.mxu0  ;;  %v3573_v16 = vld [vmem:[#allocation26_spill] sm:$0xff] }
 0x19d   :  { %v1001_v22 = vadd.f32 %v1000_v28, %v3040_v36  ;;  %v3574_v36 = vld [vmem:[#allocation14_spill] sm:$0xff] }
 0x19e   :  { %v2660_v56 = vpack.c.bf16 %v3254_v33, %v3252_v6 }
 0x19f   :  { %1315 = vmatmul.bf16.gmra.mxu1 %v2950_v59  ;;  %1582 = vmatmul.bf16.gmra.mxu0 %v2950_v59 }
 0x1a0   :  { %2696 = vst [vmem:[#allocation7 + $0x50] sm:$0xff] %v2660_v56   ;;  %1404 = vmatmul.bf16.gmra.mxu2 %v2912_v60  ;;  %1493 = vmatmul.bf16.gmra.mxu3 %v2948_v58 }
 0x1a3   :  { %v1089_v26 = vpop.f32.mrf.mxu2  ;;  %v1178_v24 = vpop.f32.mrf.mxu3 }
 0x1a4   :  { %v3264_v55 = vadd.f32 %v1267_v32, %v1178_v24  ;;  %v1002_v12 = vpop.f32.mrf.mxu1  ;;  %v1269_v39 = vpop.f32.mrf.mxu0  ;;  %v3268_v43 = vadd.f32 %v1089_v26, %v1001_v22  ;;  %v3577_v26 = vld [vmem:[#allocation27_spill] sm:$0xff] }
 0x1a5   :  { %v1003_v8 = vadd.f32 %v1002_v12, %v3048_v15  ;;  %v3575_v15 = vld [vmem:[#allocation25_spill] sm:$0xff]  ;;  %v3578_v12 = vld [vmem:[#allocation28_spill] sm:$0xff] }
 0x1ab   :  { %v1091_v52 = vpop.f32.mrf.mxu2  ;;  %v1180_v2 = vpop.f32.mrf.mxu3 }
 0x1ac   :  { %v3270_v59 = vadd.f32 %v1091_v52, %v1003_v8  ;;  %v3272_v4 = vadd.f32 %v1269_v39, %v1180_v2  ;;  %v1005_v60 = vpop.f32.mrf.mxu1  ;;  %v1272_v58 = vpop.f32.mrf.mxu0 }
 0x1ad   :  { %v1006_v24 = vadd.f32 %v1005_v60, %v3577_v26  ;;  %v3583_v60 = vld [vmem:[#allocation17_spill] sm:$0xff] }
 0x1ae   :  { %v2665_v61 = vpack.c.bf16 %v3270_v59, %v3268_v43 }
 0x1af   :  { %1320 = vmatmul.bf16.gmra.mxu1 %v3573_v16  ;;  %1587 = vmatmul.bf16.gmra.mxu0 %v3573_v16 }
 0x1b0   :  { %2697 = vst [vmem:[#allocation7 + $0x58] sm:$0xff] %v2665_v61   ;;  %1409 = vmatmul.bf16.gmra.mxu2 %v3574_v36  ;;  %1498 = vmatmul.bf16.gmra.mxu3 %v3575_v15  ;;  %v3582_v15 = vld [vmem:[#allocation30_spill] sm:$0xff] }
 0x1b3   :  { %v1094_v38 = vpop.f32.mrf.mxu2  ;;  %v1183_v10 = vpop.f32.mrf.mxu3 }
 0x1b4   :  { %v3280_v28 = vadd.f32 %v1272_v58, %v1183_v10  ;;  %v1007_v32 = vpop.f32.mrf.mxu1  ;;  %v1274_v56 = vpop.f32.mrf.mxu0  ;;  %v3284_v52 = vadd.f32 %v1094_v38, %v1006_v24  ;;  %v3584_v10 = vld [vmem:[#allocation29_spill] sm:$0xff] }
 0x1b5   :  { %v1008_v39 = vadd.f32 %v1007_v32, %v3578_v12  ;;  %v3586_v12 = vld [vmem:[#allocation31_spill] sm:$0xff] }
 0x1b6   :  { %3576 = vst [vmem:[#allocation26_spill] sm:$0xff] %v3280_v28 }
 0x1b7   :  { %3579 = vst [vmem:[#allocation14_spill] sm:$0xff] %v3284_v52 }
 0x1bb   :  { %v1096_v22 = vpop.f32.mrf.mxu2  ;;  %v1185_v8 = vpop.f32.mrf.mxu3 }
 0x1bc   :  { %v3286_v2 = vadd.f32 %v1096_v22, %v1008_v39  ;;  %v3288_v61 = vadd.f32 %v1274_v56, %v1185_v8  ;;  %v1010_v16 = vpop.f32.mrf.mxu1  ;;  %v1277_v36 = vpop.f32.mrf.mxu0  ;;  %v3587_v22 = vld [vmem:[#allocation32_spill] sm:$0xff] }
 0x1bd   :  { %v1011_v39 = vadd.f32 %v1010_v16, %v3586_v12  ;;  %v3592_v16 = vld [vmem:[#allocation20_spill] sm:$0xff] }
 0x1be   :  { %3580 = vst [vmem:[#allocation25_spill] sm:$0xff] %v3286_v2  ;;  %v2670_v58 = vpack.c.bf16 %v3286_v2, %v3284_v52 }
 0x1bf   :  { %3581 = vst [vmem:[#allocation27_spill] sm:$0xff] %v3288_v61  ;;  %1325 = vmatmul.bf16.gmra.mxu1 %v3582_v15  ;;  %1592 = vmatmul.bf16.gmra.mxu0 %v3582_v15 }
 0x1c0   :  { %2698 = vst [vmem:[#allocation7 + $0x60] sm:$0xff] %v2670_v58   ;;  %1414 = vmatmul.bf16.gmra.mxu2 %v3583_v60  ;;  %1503 = vmatmul.bf16.gmra.mxu3 %v3584_v10 }
 0x1c3   :  { %v1099_v38 = vpop.f32.mrf.mxu2  ;;  %v1188_v32 = vpop.f32.mrf.mxu3 }
 0x1c4   :  { %v3296_v26 = vadd.f32 %v1277_v36, %v1188_v32  ;;  %v1012_v56 = vpop.f32.mrf.mxu1  ;;  %v1279_v24 = vpop.f32.mrf.mxu0  ;;  %v3300_v52 = vadd.f32 %v1099_v38, %v1011_v39  ;;  %v3591_v32 = vld [vmem:[#allocation34_spill] sm:$0xff]  ;;  %v3595_v39 = vld [vmem:[#allocation35_spill] sm:$0xff] }
 0x1c5   :  { %v1013_v8 = vadd.f32 %v1012_v56, %v3587_v22  ;;  %v3593_v56 = vld [vmem:[#allocation33_spill] sm:$0xff] }
 0x1c6   :  { %3585 = vst [vmem:[#allocation28_spill] sm:$0xff] %v3296_v26 }
 0x1c7   :  { %3588 = vst [vmem:[#allocation30_spill] sm:$0xff] %v3300_v52 }
 0x1cb   :  { %v1101_v2 = vpop.f32.mrf.mxu2  ;;  %v1190_v61 = vpop.f32.mrf.mxu3 }
 0x1cc   :  { %v3302_v15 = vadd.f32 %v1101_v2, %v1013_v8  ;;  %v3304_v58 = vadd.f32 %v1279_v24, %v1190_v61  ;;  %v1015_v60 = vpop.f32.mrf.mxu1  ;;  %v1282_v10 = vpop.f32.mrf.mxu0  ;;  %v3596_v8 = vld [vmem:[#allocation36_spill] sm:$0xff] }
 0x1cd   :  { %v1016_v22 = vadd.f32 %v1015_v60, %v3595_v39  ;;  %v3601_v60 = vld [vmem:[#allocation23_spill] sm:$0xff] }
 0x1ce   :  { %3589 = vst [vmem:[#allocation17_spill] sm:$0xff] %v3302_v15  ;;  %v2675_v36 = vpack.c.bf16 %v3302_v15, %v3300_v52 }
 0x1cf   :  { %3590 = vst [vmem:[#allocation29_spill] sm:$0xff] %v3304_v58  ;;  %1330 = vmatmul.bf16.gmra.mxu1 %v3591_v32  ;;  %1597 = vmatmul.bf16.gmra.mxu0 %v3591_v32 }
 0x1d0   :  { %2699 = vst [vmem:[#allocation7 + $0x68] sm:$0xff] %v2675_v36   ;;  %1419 = vmatmul.bf16.gmra.mxu2 %v3592_v16  ;;  %1508 = vmatmul.bf16.gmra.mxu3 %v3593_v56 }
 0x1d3   :  { %v1104_v38 = vpop.f32.mrf.mxu2  ;;  %v1193_v12 = vpop.f32.mrf.mxu3 }
 0x1d4   :  { %v3312_v2 = vadd.f32 %v1282_v10, %v1193_v12  ;;  %v1017_v61 = vpop.f32.mrf.mxu1  ;;  %v1284_v24 = vpop.f32.mrf.mxu0  ;;  %v3316_v26 = vadd.f32 %v1104_v38, %v1016_v22  ;;  %v3600_v12 = vld [vmem:[#allocation38_spill] sm:$0xff] }
 0x1d5   :  { %v1018_v58 = vadd.f32 %v1017_v61, %v3596_v8  ;;  %v3602_v61 = vld [vmem:[#allocation37_spill] sm:$0xff]  ;;  %v3605_v8 = vld [vmem:[#allocation40_spill] sm:$0xff] }
 0x1d6   :  { %3594 = vst [vmem:[#allocation31_spill] sm:$0xff] %v3312_v2 }
 0x1d7   :  { %3597 = vst [vmem:[#allocation32_spill] sm:$0xff] %v3316_v26 }
 0x1db   :  { %v1106_v15 = vpop.f32.mrf.mxu2  ;;  %v1195_v52 = vpop.f32.mrf.mxu3 }
 0x1dc   :  { %v3318_v32 = vadd.f32 %v1106_v15, %v1018_v58  ;;  %v3320_v36 = vadd.f32 %v1284_v24, %v1195_v52  ;;  %v1020_v16 = vpop.f32.mrf.mxu1  ;;  %v1287_v56 = vpop.f32.mrf.mxu0  ;;  %v3604_v24 = vld [vmem:[#allocation39_spill] sm:$0xff] }
 0x1dd   :  { %v1021_v22 = vadd.f32 %v1020_v16, %v3604_v24  ;;  %v3610_v16 = vld [vmem:[#allocation15_spill] sm:$0xff] }
 0x1de   :  { %3598 = vst [vmem:[#allocation34_spill] sm:$0xff] %v3318_v32  ;;  %v2680_v10 = vpack.c.bf16 %v3318_v32, %v3316_v26 }
 0x1df   :  { %3599 = vst [vmem:[#allocation20_spill] sm:$0xff] %v3320_v36  ;;  %1335 = vmatmul.bf16.gmra.mxu1 %v3600_v12  ;;  %1602 = vmatmul.bf16.gmra.mxu0 %v3600_v12 }
 0x1e0   :  { %2700 = vst [vmem:[#allocation7 + $0x70] sm:$0xff] %v2680_v10   ;;  %1424 = vmatmul.bf16.gmra.mxu2 %v3601_v60  ;;  %1513 = vmatmul.bf16.gmra.mxu3 %v3602_v61 }
 0x1e3   :  { %v1109_v38 = vpop.f32.mrf.mxu2  ;;  %v1198_v39 = vpop.f32.mrf.mxu3 }
 0x1e4   :  { %v3328_v15 = vadd.f32 %v1287_v56, %v1198_v39  ;;  %v1022_v52 = vpop.f32.mrf.mxu1  ;;  %v1289_v58 = vpop.f32.mrf.mxu0  ;;  %v3332_v2 = vadd.f32 %v1109_v38, %v1021_v22  ;;  %v3609_v39 = vld [vmem:[#allocation42_spill] sm:$0xff]  ;;  %v3612_v38 = vld [vmem:[#allocation43_spill] sm:$0xff] }
 0x1e5   :  { %v1023_v36 = vadd.f32 %v1022_v52, %v3605_v8  ;;  %v3611_v52 = vld [vmem:[#allocation41_spill] sm:$0xff] }
 0x1e6   :  { %3603 = vst [vmem:[#allocation33_spill] sm:$0xff] %v3328_v15 }
 0x1e7   :  { %3606 = vst [vmem:[#allocation35_spill] sm:$0xff] %v3332_v2 }
 0x1eb   :  { %v1111_v32 = vpop.f32.mrf.mxu2  ;;  %v1200_v26 = vpop.f32.mrf.mxu3 }
 0x1ec   :  { %v3334_v12 = vadd.f32 %v1111_v32, %v1023_v36  ;;  %v3336_v10 = vadd.f32 %v1289_v58, %v1200_v26  ;;  %v1301_v60 = vpop.f32.mrf.mxu1  ;;  %v1568_v61 = vpop.f32.mrf.mxu0 }
 0x1ed   :  { %v1302_v24 = vadd.f32 %v1301_v60, %v3612_v38 }
 0x1ee   :  { %3607 = vst [vmem:[#allocation36_spill] sm:$0xff] %v3334_v12  ;;  %v2685_v56 = vpack.c.bf16 %v3334_v12, %v3332_v2 }
 0x1ef   :  { %3608 = vst [vmem:[#allocation38_spill] sm:$0xff] %v3336_v10  ;;  %1340 = vmatmul.bf16.gmra.mxu1 %v3609_v39  ;;  %1607 = vmatmul.bf16.gmra.mxu0 %v3609_v39  ;;  %v1648_v8 = vpack.c.bf16 %v1302_v24, %v3066_v20  ;;  %v3615_v24 = vld [vmem:[#allocation45_spill] sm:$0xff] }
 0x1f0   :  { %2701 = vst [vmem:[#allocation7 + $0x78] sm:$0xff] %v2685_v56   ;;  %1429 = vmatmul.bf16.gmra.mxu2 %v3610_v16  ;;  %1518 = vmatmul.bf16.gmra.mxu3 %v3611_v52 }
 0x1f1   :  { %v1808_v2 = vrot.slane %v1648_v8, 4  ;;  %1981 = dma.vmem_to_hbm [thread:$0]  %s1974_s1, 2048, %s1976_s26, [#allocation4], %s2845_s27, %s2845_s27, %s2846_s28  }
 0x1f3   :  { %v1390_v32 = vpop.f32.mrf.mxu2  ;;  %v1479_v36 = vpop.f32.mrf.mxu3 }
 0x1f4   :  { %v1480_v26 = vadd.f32 %v1479_v36, %v1390_v32  ;;  %v1303_v58 = vpop.f32.mrf.mxu1  ;;  %v1570_v22 = vpop.f32.mrf.mxu0 }
 0x1f5   :  { %v1304_v56 = vadd.f32 %v1303_v58, %v3070_v41 }
 0x1f6   :  { %v1569_v10 = vadd.f32 %v1568_v61, %v1480_v26 }
 0x1f7   :  { %v1650_v32 = vpack.c.bf16 %v1304_v56, %v3068_v51 }
 0x1f8   :  { %v1649_v12 = vpack.c.bf16 %v1569_v10, %v1569_v10  ;;  %v3613_v10 = vld [vmem:[#allocation18_spill] sm:$0xff] }
 0x1f9   :  { %v1810_v41 = vrot.slane %v1650_v32, 4 }
 0x1fa   :  { %v1809_v15 = vrot.slane %v1649_v12, 4  ;;  %v3614_v12 = vld [vmem:[#allocation44_spill] sm:$0xff] }
 0x1fb   :  { %v1392_v39 = vpop.f32.mrf.mxu2  ;;  %v1481_v16 = vpop.f32.mrf.mxu3 }
 0x1fc   :  { %v1873_v52 = vsel %vm1872_vm0, %v1808_v2, %v1809_v15  ;;  %v1482_v28 = vadd.f32 %v1481_v16, %v1392_v39  ;;  %v1306_v60 = vpop.f32.mrf.mxu1  ;;  %v1573_v38 = vpop.f32.mrf.mxu0 }
 0x1fd   :  { %1937 = vst [vmem:[#allocation8] sm:$0xff] %v1873_v52  ;;  %v1307_v2 = vadd.f32 %v1306_v60, %v3615_v24 }
 0x1fe   :  { %v1571_v36 = vadd.f32 %v1570_v22, %v1482_v28 }
 0x1ff   :  { %1345 = vmatmul.bf16.gmra.mxu1 %v3072_v27  ;;  %1612 = vmatmul.bf16.gmra.mxu0 %v3072_v27  ;;  %v1652_v22 = vpack.c.bf16 %v1307_v2, %v3086_v53  ;;  %v3619_v2 = vld [vmem:[#allocation46_spill] sm:$0xff] }
 0x200   :  { %v1651_v20 = vpack.c.bf16 %v1571_v36, %v1571_v36  ;;  %1434 = vmatmul.bf16.gmra.mxu2 %v3613_v10  ;;  %1523 = vmatmul.bf16.gmra.mxu3 %v3614_v12 }
 0x201   :  { %v1812_v39 = vrot.slane %v1652_v22, 4 }
 0x202   :  { %v1811_v61 = vrot.slane %v1651_v20, 4 }
 0x203   :  { %v1395_v15 = vpop.f32.mrf.mxu2  ;;  %v1484_v26 = vpop.f32.mrf.mxu3 }
 0x204   :  { %v1874_v58 = vsel %vm1872_vm0, %v1810_v41, %v1811_v61  ;;  %v1485_v8 = vadd.f32 %v1484_v26, %v1395_v15  ;;  %v1308_v51 = vpop.f32.mrf.mxu1  ;;  %v1575_v28 = vpop.f32.mrf.mxu0  ;;  %v3616_v41 = vld [vmem:[#allocation47_spill] sm:$0xff]  ;;  %v3617_v15 = vld [vmem:[#allocation48_spill] sm:$0xff] }
 0x205   :  { %1938 = vst [vmem:[#allocation8 + $0x8] sm:$0xff] %v1874_v58  ;;  %v1309_v52 = vadd.f32 %v1308_v51, %v3090_v17  ;;  %v3620_v58 = vld [vmem:[#allocation49_spill] sm:$0xff] }
 0x206   :  { %v1574_v27 = vadd.f32 %v1573_v38, %v1485_v8  ;;  %v3618_v38 = vld [vmem:[#allocation21_spill] sm:$0xff] }
 0x207   :  { %v1654_v61 = vpack.c.bf16 %v1309_v52, %v3616_v41 }
 0x208   :  { %v1653_v56 = vpack.c.bf16 %v1574_v27, %v1574_v27 }
 0x209   :  { %v1814_v17 = vrot.slane %v1654_v61, 4 }
 0x20a   :  { %v1813_v16 = vrot.slane %v1653_v56, 4 }
 0x20b   :  { %v1397_v32 = vpop.f32.mrf.mxu2  ;;  %v1486_v36 = vpop.f32.mrf.mxu3 }
 0x20c   :  { %v1875_v60 = vsel %vm1872_vm0, %v1812_v39, %v1813_v16  ;;  %v1487_v20 = vadd.f32 %v1486_v36, %v1397_v32  ;;  %v1311_v10 = vpop.f32.mrf.mxu1  ;;  %v1578_v12 = vpop.f32.mrf.mxu0 }
 0x20d   :  { %1939 = vst [vmem:[#allocation8 + $0x10] sm:$0xff] %v1875_v60  ;;  %v1312_v8 = vadd.f32 %v1311_v10, %v3620_v58  ;;  %v3623_v58 = vld [vmem:[#allocation51_spill] sm:$0xff] }
 0x20e   :  { %v1576_v24 = vadd.f32 %v1575_v28, %v1487_v20 }
 0x20f   :  { %1350 = vmatmul.bf16.gmra.mxu1 %v3617_v15  ;;  %1617 = vmatmul.bf16.gmra.mxu0 %v3617_v15  ;;  %v1656_v16 = vpack.c.bf16 %v1312_v8, %v3106_v13 }
 0x210   :  { %v1655_v53 = vpack.c.bf16 %v1576_v24, %v1576_v24  ;;  %1439 = vmatmul.bf16.gmra.mxu2 %v3618_v38  ;;  %1528 = vmatmul.bf16.gmra.mxu3 %v3619_v2 }
 0x211   :  { %v1816_v36 = vrot.slane %v1656_v16, 4 }
 0x212   :  { %v1815_v26 = vrot.slane %v1655_v53, 4 }
 0x213   :  { %v1400_v51 = vpop.f32.mrf.mxu2  ;;  %v1489_v22 = vpop.f32.mrf.mxu3 }
 0x214   :  { %v1876_v27 = vsel %vm1872_vm0, %v1814_v17, %v1815_v26  ;;  %v1490_v56 = vadd.f32 %v1489_v22, %v1400_v51  ;;  %v1313_v39 = vpop.f32.mrf.mxu1  ;;  %v1580_v28 = vpop.f32.mrf.mxu0  ;;  %v3622_v17 = vld [vmem:[#allocation50_spill] sm:$0xff] }
 0x215   :  { %1940 = vst [vmem:[#allocation8 + $0x18] sm:$0xff] %v1876_v27  ;;  %v1314_v20 = vadd.f32 %v1313_v39, %v3110_v37 }
 0x216   :  { %v1579_v52 = vadd.f32 %v1578_v12, %v1490_v56  ;;  %v3621_v12 = vld [vmem:[#allocation24_spill] sm:$0xff] }
 0x217   :  { %v1658_v38 = vpack.c.bf16 %v1314_v20, %v3108_v1 }
 0x218   :  { %v1657_v32 = vpack.c.bf16 %v1579_v52, %v1579_v52 }
 0x219   :  { %v1818_v37 = vrot.slane %v1658_v38, 4 }
 0x21a   :  { %v1817_v60 = vrot.slane %v1657_v32, 4 }
 0x21b   :  { %v1402_v41 = vpop.f32.mrf.mxu2  ;;  %v1491_v61 = vpop.f32.mrf.mxu3 }
 0x21c   :  { %v1877_v10 = vsel %vm1872_vm0, %v1816_v36, %v1817_v60  ;;  %v1492_v24 = vadd.f32 %v1491_v61, %v1402_v41  ;;  %v1316_v15 = vpop.f32.mrf.mxu1  ;;  %v1583_v53 = vpop.f32.mrf.mxu0 }
 0x21d   :  { %1941 = vst [vmem:[#allocation8 + $0x20] sm:$0xff] %v1877_v10  ;;  %v1317_v8 = vadd.f32 %v1316_v15, %v3623_v58  ;;  %v3624_v15 = vld [vmem:[#allocation53_spill] sm:$0xff] }
 0x21e   :  { %v1581_v2 = vadd.f32 %v1580_v28, %v1492_v24 }
 0x21f   :  { %1355 = vmatmul.bf16.gmra.mxu1 %v3112_v40  ;;  %1622 = vmatmul.bf16.gmra.mxu0 %v3112_v40  ;;  %v1660_v28 = vpack.c.bf16 %v1317_v8, %v3126_v18 }
 0x220   :  { %v1659_v13 = vpack.c.bf16 %v1581_v2, %v1581_v2  ;;  %1444 = vmatmul.bf16.gmra.mxu2 %v3621_v12  ;;  %1533 = vmatmul.bf16.gmra.mxu3 %v3622_v17  ;;  %v3627_v12 = vld [vmem:[#allocation52_spill] sm:$0xff] }
 0x221   :  { %v1820_v52 = vrot.slane %v1660_v28, 4 }
 0x222   :  { %v1819_v26 = vrot.slane %v1659_v13, 4  ;;  %v3625_v13 = vld [vmem:[#allocation54_spill] sm:$0xff] }
 0x223   :  { %v1405_v51 = vpop.f32.mrf.mxu2  ;;  %v1494_v22 = vpop.f32.mrf.mxu3 }
 0x224   :  { %v1878_v27 = vsel %vm1872_vm0, %v1818_v37, %v1819_v26  ;;  %v1495_v56 = vadd.f32 %v1494_v22, %v1405_v51  ;;  %v1318_v1 = vpop.f32.mrf.mxu1  ;;  %v1585_v39 = vpop.f32.mrf.mxu0  ;;  %v3628_v37 = vld [vmem:[#allocation55_spill] sm:$0xff] }
 0x225   :  { %1942 = vst [vmem:[#allocation8 + $0x28] sm:$0xff] %v1878_v27  ;;  %v1319_v36 = vadd.f32 %v1318_v1, %v3130_v46 }
 0x226   :  { %v1584_v40 = vadd.f32 %v1583_v53, %v1495_v56  ;;  %v3626_v53 = vld [vmem:[#allocation16_spill] sm:$0xff] }
 0x227   :  { %v1662_v38 = vpack.c.bf16 %v1319_v36, %v3624_v15 }
 0x228   :  { %v1661_v16 = vpack.c.bf16 %v1584_v40, %v1584_v40 }
 0x229   :  { %v1822_v46 = vrot.slane %v1662_v38, 4  ;;  %v3630_v38 = vld [vmem:[#allocation56_spill] sm:$0xff] }
 0x22a   :  { %v1821_v32 = vrot.slane %v1661_v16, 4 }
 0x22b   :  { %v1407_v60 = vpop.f32.mrf.mxu2  ;;  %v1496_v20 = vpop.f32.mrf.mxu3 }
 0x22c   :  { %v1879_v41 = vsel %vm1872_vm0, %v1820_v52, %v1821_v32  ;;  %v1497_v61 = vadd.f32 %v1496_v20, %v1407_v60  ;;  %v1321_v10 = vpop.f32.mrf.mxu1  ;;  %v1588_v24 = vpop.f32.mrf.mxu0 }
 0x22d   :  { %1943 = vst [vmem:[#allocation8 + $0x30] sm:$0xff] %v1879_v41  ;;  %v1322_v26 = vadd.f32 %v1321_v10, %v3628_v37 }
 0x22e   :  { %v1586_v2 = vadd.f32 %v1585_v39, %v1497_v61 }
 0x22f   :  { %1360 = vmatmul.bf16.gmra.mxu1 %v3625_v13  ;;  %1627 = vmatmul.bf16.gmra.mxu0 %v3625_v13  ;;  %v1664_v1 = vpack.c.bf16 %v1322_v26, %v3146_v7  ;;  %v3631_v13 = vld [vmem:[#allocation57_spill] sm:$0xff] }
 0x230   :  { %v1663_v18 = vpack.c.bf16 %v1586_v2, %v1586_v2  ;;  %1449 = vmatmul.bf16.gmra.mxu2 %v3626_v53  ;;  %1538 = vmatmul.bf16.gmra.mxu3 %v3627_v12 }
 0x231   :  { %v1824_v40 = vrot.slane %v1664_v1, 4 }
 0x232   :  { %v1823_v17 = vrot.slane %v1663_v18, 4 }
 0x233   :  { %v1410_v58 = vpop.f32.mrf.mxu2  ;;  %v1499_v8 = vpop.f32.mrf.mxu3 }
 0x234   :  { %v1880_v51 = vsel %vm1872_vm0, %v1822_v46, %v1823_v17  ;;  %v1500_v22 = vadd.f32 %v1499_v8, %v1410_v58  ;;  %v1323_v27 = vpop.f32.mrf.mxu1  ;;  %v1590_v56 = vpop.f32.mrf.mxu0 }
 0x235   :  { %1944 = vst [vmem:[#allocation8 + $0x38] sm:$0xff] %v1880_v51  ;;  %v1324_v52 = vadd.f32 %v1323_v27, %v3150_v54 }
 0x236   :  { %v1589_v39 = vadd.f32 %v1588_v24, %v1500_v22  ;;  %v3629_v24 = vld [vmem:[#allocation19_spill] sm:$0xff] }
 0x237   :  { %v1666_v10 = vpack.c.bf16 %v1324_v52, %v3148_v3 }
 0x238   :  { %v1665_v28 = vpack.c.bf16 %v1589_v39, %v1589_v39 }
 0x239   :  { %v1826_v54 = vrot.slane %v1666_v10, 4 }
 0x23a   :  { %v1825_v16 = vrot.slane %v1665_v28, 4 }
 0x23b   :  { %v1412_v32 = vpop.f32.mrf.mxu2  ;;  %v1501_v36 = vpop.f32.mrf.mxu3 }
 0x23c   :  { %v1881_v60 = vsel %vm1872_vm0, %v1824_v40, %v1825_v16  ;;  %v1502_v20 = vadd.f32 %v1501_v36, %v1412_v32  ;;  %v1326_v41 = vpop.f32.mrf.mxu1  ;;  %v1593_v61 = vpop.f32.mrf.mxu0  ;;  %v3632_v32 = vld [vmem:[#allocation59_spill] sm:$0xff]  ;;  %v3633_v36 = vld [vmem:[#allocation22_spill] sm:$0xff] }
 0x23d   :  { %1945 = vst [vmem:[#allocation8 + $0x40] sm:$0xff] %v1881_v60  ;;  %v1327_v18 = vadd.f32 %v1326_v41, %v3631_v13  ;;  %v3634_v60 = vld [vmem:[#allocation58_spill] sm:$0xff]  ;;  %v3635_v41 = vld [vmem:[#allocation60_spill] sm:$0xff] }
 0x23e   :  { %v1591_v15 = vadd.f32 %v1590_v56, %v1502_v20 }
 0x23f   :  { %1365 = vmatmul.bf16.gmra.mxu1 %v3152_v44  ;;  %1632 = vmatmul.bf16.gmra.mxu0 %v3152_v44  ;;  %v1668_v26 = vpack.c.bf16 %v1327_v18, %v3166_v48 }
 0x240   :  { %v1667_v7 = vpack.c.bf16 %v1591_v15, %v1591_v15  ;;  %1454 = vmatmul.bf16.gmra.mxu2 %v3629_v24  ;;  %1543 = vmatmul.bf16.gmra.mxu3 %v3630_v38 }
 0x241   :  { %v1828_v8 = vrot.slane %v1668_v26, 4 }
 0x242   :  { %v1827_v2 = vrot.slane %v1667_v7, 4 }
 0x243   :  { %v1415_v53 = vpop.f32.mrf.mxu2  ;;  %v1504_v12 = vpop.f32.mrf.mxu3 }
 0x244   :  { %v1882_v46 = vsel %vm1872_vm0, %v1826_v54, %v1827_v2  ;;  %v1505_v17 = vadd.f32 %v1504_v12, %v1415_v53  ;;  %v1328_v3 = vpop.f32.mrf.mxu1  ;;  %v1595_v37 = vpop.f32.mrf.mxu0 }
 0x245   :  { %1946 = vst [vmem:[#allocation8 + $0x48] sm:$0xff] %v1882_v46  ;;  %v1329_v22 = vadd.f32 %v1328_v3, %v3170_v62 }
 0x246   :  { %v1594_v44 = vadd.f32 %v1593_v61, %v1505_v17 }
 0x247   :  { %v1670_v16 = vpack.c.bf16 %v1329_v22, %v3168_v49 }
 0x248   :  { %v1669_v58 = vpack.c.bf16 %v1594_v44, %v1594_v44 }
 0x249   :  { %v1830_v62 = vrot.slane %v1670_v16, 4 }
 0x24a   :  { %v1829_v51 = vrot.slane %v1669_v58, 4 }
 0x24b   :  { %v1417_v27 = vpop.f32.mrf.mxu2  ;;  %v1506_v56 = vpop.f32.mrf.mxu3 }
 0x24c   :  { %v1883_v1 = vsel %vm1872_vm0, %v1828_v8, %v1829_v51  ;;  %v1507_v39 = vadd.f32 %v1506_v56, %v1417_v27  ;;  %v1331_v28 = vpop.f32.mrf.mxu1  ;;  %v1598_v40 = vpop.f32.mrf.mxu0 }
 0x24d   :  { %1947 = vst [vmem:[#allocation8 + $0x50] sm:$0xff] %v1883_v1  ;;  %v1332_v61 = vadd.f32 %v1331_v28, %v3635_v41 }
 0x24e   :  { %v1596_v52 = vadd.f32 %v1595_v37, %v1507_v39 }
 0x24f   :  { %1370 = vmatmul.bf16.gmra.mxu1 %v3632_v32  ;;  %1637 = vmatmul.bf16.gmra.mxu0 %v3632_v32  ;;  %v1672_v54 = vpack.c.bf16 %v1332_v61, %v3186_v0 }
 0x250   :  { %v1671_v48 = vpack.c.bf16 %v1596_v52, %v1596_v52  ;;  %1459 = vmatmul.bf16.gmra.mxu2 %v3633_v36  ;;  %1548 = vmatmul.bf16.gmra.mxu3 %v3634_v60 }
 0x251   :  { %v1832_v18 = vrot.slane %v1672_v54, 4 }
 0x252   :  { %v1831_v20 = vrot.slane %v1671_v48, 4 }
 0x253   :  { %v1420_v10 = vpop.f32.mrf.mxu2  ;;  %v1509_v15 = vpop.f32.mrf.mxu3 }
 0x254   :  { %v1884_v7 = vsel %vm1872_vm0, %v1830_v62, %v1831_v20  ;;  %v1510_v24 = vadd.f32 %v1509_v15, %v1420_v10  ;;  %v1333_v49 = vpop.f32.mrf.mxu1  ;;  %v1600_v38 = vpop.f32.mrf.mxu0 }
 0x255   :  { %1948 = vst [vmem:[#allocation8 + $0x58] sm:$0xff] %v1884_v7  ;;  %v1334_v12 = vadd.f32 %v1333_v49, %v3190_v57 }
 0x256   :  { %v1599_v2 = vadd.f32 %v1598_v40, %v1510_v24 }
 0x257   :  { %v1674_v58 = vpack.c.bf16 %v1334_v12, %v3188_v42 }
 0x258   :  { %v1673_v13 = vpack.c.bf16 %v1599_v2, %v1599_v2 }
 0x259   :  { %v1834_v57 = vrot.slane %v1674_v58, 4 }
 0x25a   :  { %v1833_v53 = vrot.slane %v1673_v13, 4 }
 0x25b   :  { %v1422_v46 = vpop.f32.mrf.mxu2  ;;  %v1511_v17 = vpop.f32.mrf.mxu3 }
 0x25c   :  { %v1885_v3 = vsel %vm1872_vm0, %v1832_v18, %v1833_v53  ;;  %v1512_v37 = vadd.f32 %v1511_v17, %v1422_v46  ;;  %v1336_v26 = vpop.f32.mrf.mxu1  ;;  %v1603_v44 = vpop.f32.mrf.mxu0 }
 0x25d   :  { %1949 = vst [vmem:[#allocation8 + $0x60] sm:$0xff] %v1885_v3  ;;  %v1337_v22 = vadd.f32 %v1336_v26, %v3200_v19 }
 0x25e   :  { %v1601_v8 = vadd.f32 %v1600_v38, %v1512_v37 }
 0x25f   :  { %1375 = vmatmul.bf16.gmra.mxu1 %v3192_v31  ;;  %1642 = vmatmul.bf16.gmra.mxu0 %v3192_v31  ;;  %v1676_v40 = vpack.c.bf16 %v1337_v22, %v3204_v45 }
 0x260   :  { %v1675_v0 = vpack.c.bf16 %v1601_v8, %v1601_v8  ;;  %1464 = vmatmul.bf16.gmra.mxu2 %v2918_v63  ;;  %1553 = vmatmul.bf16.gmra.mxu3 %v3184_v11 }
 0x261   :  { %v1836_v52 = vrot.slane %v1676_v40, 4 }
 0x262   :  { %v1835_v51 = vrot.slane %v1675_v0, 4 }
 0x263   :  { %v1425_v27 = vpop.f32.mrf.mxu2  ;;  %v1514_v56 = vpop.f32.mrf.mxu3 }
 0x264   :  { %v1886_v1 = vsel %vm1872_vm0, %v1834_v57, %v1835_v51  ;;  %v1515_v39 = vadd.f32 %v1514_v56, %v1425_v27  ;;  %v1338_v42 = vpop.f32.mrf.mxu1  ;;  %v1605_v28 = vpop.f32.mrf.mxu0 }
 0x265   :  { %1950 = vst [vmem:[#allocation8 + $0x68] sm:$0xff] %v1886_v1  ;;  %v1339_v11 = vadd.f32 %v1338_v42, %v3208_v14 }
 0x266   :  { %v1604_v31 = vadd.f32 %v1603_v44, %v1515_v39 }
 0x267   :  { %v1678_v20 = vpack.c.bf16 %v1339_v11, %v3206_v9 }
 0x268   :  { %v1677_v16 = vpack.c.bf16 %v1604_v31, %v1604_v31 }
 0x269   :  { %v1838_v10 = vrot.slane %v1678_v20, 4 }
 0x26a   :  { %v1837_v63 = vrot.slane %v1677_v16, 4 }
 0x26b   :  { %v1427_v32 = vpop.f32.mrf.mxu2  ;;  %v1516_v48 = vpop.f32.mrf.mxu3 }
 0x26c   :  { %v1887_v19 = vsel %vm1872_vm0, %v1836_v52, %v1837_v63  ;;  %v1517_v36 = vadd.f32 %v1516_v48, %v1427_v32  ;;  %v1341_v60 = vpop.f32.mrf.mxu1  ;;  %v1608_v62 = vpop.f32.mrf.mxu0 }
 0x26d   :  { %1951 = vst [vmem:[#allocation8 + $0x70] sm:$0xff] %v1887_v19  ;;  %v1342_v15 = vadd.f32 %v1341_v60, %v3216_v47 }
 0x26e   :  { %v1606_v41 = vadd.f32 %v1605_v28, %v1517_v36 }
 0x26f   :  { %v1680_v9 = vpack.c.bf16 %v1342_v15, %v3220_v34 }
 0x270   :  { %v1679_v61 = vpack.c.bf16 %v1606_v41, %v1606_v41 }
 0x271   :  { %v1840_v13 = vrot.slane %v1680_v9, 4 }
 0x272   :  { %v1839_v45 = vrot.slane %v1679_v61, 4 }
 0x273   :  { %v1430_v7 = vpop.f32.mrf.mxu2  ;;  %v1519_v24 = vpop.f32.mrf.mxu3 }
 0x274   :  { %v1888_v14 = vsel %vm1872_vm0, %v1838_v10, %v1839_v45  ;;  %v1520_v49 = vadd.f32 %v1519_v24, %v1430_v7  ;;  %v1343_v38 = vpop.f32.mrf.mxu1  ;;  %v1610_v54 = vpop.f32.mrf.mxu0 }
 0x275   :  { %1952 = vst [vmem:[#allocation8 + $0x78] sm:$0xff] %v1888_v14  ;;  %v1344_v53 = vadd.f32 %v1343_v38, %v3224_v21 }
 0x276   :  { %v1609_v2 = vadd.f32 %v1608_v62, %v1520_v49 }
 0x277   :  { %v1682_v44 = vpack.c.bf16 %v1344_v53, %v3222_v5 }
 0x278   :  { %v1681_v47 = vpack.c.bf16 %v1609_v2, %v1609_v2 }
 0x279   :  { %v1842_v8 = vrot.slane %v1682_v44, 4 }
 0x27a   :  { %v1841_v18 = vrot.slane %v1681_v47, 4 }
 0x27b   :  { %v1432_v12 = vpop.f32.mrf.mxu2  ;;  %v1521_v46 = vpop.f32.mrf.mxu3 }
 0x27c   :  { %v1889_v17 = vsel %vm1872_vm0, %v1840_v13, %v1841_v18  ;;  %v1522_v3 = vadd.f32 %v1521_v46, %v1432_v12  ;;  %v1346_v37 = vpop.f32.mrf.mxu1  ;;  %v1613_v26 = vpop.f32.mrf.mxu0 }
 0x27d   :  { %1953 = vst [vmem:[#allocation8 + $0x80] sm:$0xff] %v1889_v17  ;;  %v1347_v57 = vadd.f32 %v1346_v37, %v3232_v29 }
 0x27e   :  { %v1611_v34 = vadd.f32 %v1610_v54, %v1522_v3 }
 0x27f   :  { %v1684_v39 = vpack.c.bf16 %v1347_v57, %v3236_v35 }
 0x280   :  { %v1683_v58 = vpack.c.bf16 %v1611_v34, %v1611_v34 }
 0x281   :  { %v1844_v40 = vrot.slane %v1684_v39, 4 }
 0x282   :  { %v1843_v0 = vrot.slane %v1683_v58, 4 }
 0x283   :  { %v1435_v51 = vpop.f32.mrf.mxu2  ;;  %v1524_v22 = vpop.f32.mrf.mxu3 }
 0x284   :  { %v1890_v21 = vsel %vm1872_vm0, %v1842_v8, %v1843_v0  ;;  %v1525_v27 = vadd.f32 %v1524_v22, %v1435_v51  ;;  %v1348_v56 = vpop.f32.mrf.mxu1  ;;  %v1615_v1 = vpop.f32.mrf.mxu0 }
 0x285   :  { %1954 = vst [vmem:[#allocation8 + $0x88] sm:$0xff] %v1890_v21  ;;  %v1349_v31 = vadd.f32 %v1348_v56, %v3240_v50 }
 0x286   :  { %v1614_v42 = vadd.f32 %v1613_v26, %v1525_v27 }
 0x287   :  { %v1686_v48 = vpack.c.bf16 %v1349_v31, %v3238_v23 }
 0x288   :  { %v1685_v28 = vpack.c.bf16 %v1614_v42, %v1614_v42 }
 0x289   :  { %v1846_v60 = vrot.slane %v1686_v48, 4 }
 0x28a   :  { %v1845_v5 = vrot.slane %v1685_v28, 4 }
 0x28b   :  { %v1437_v16 = vpop.f32.mrf.mxu2  ;;  %v1526_v52 = vpop.f32.mrf.mxu3 }
 0x28c   :  { %v1891_v29 = vsel %vm1872_vm0, %v1844_v40, %v1845_v5  ;;  %v1527_v63 = vadd.f32 %v1526_v52, %v1437_v16  ;;  %v1351_v11 = vpop.f32.mrf.mxu1  ;;  %v1618_v32 = vpop.f32.mrf.mxu0  ;;  %v3636_v40 = vld [vmem:[#allocation26_spill] sm:$0xff] }
 0x28d   :  { %1955 = vst [vmem:[#allocation8 + $0x90] sm:$0xff] %v1891_v29  ;;  %v1352_v62 = vadd.f32 %v1351_v11, %v3248_v30  ;;  %v3637_v11 = vld [vmem:[#allocation14_spill] sm:$0xff] }
 0x28e   :  { %v1616_v19 = vadd.f32 %v1615_v1, %v1527_v63 }
 0x28f   :  { %v1688_v15 = vpack.c.bf16 %v1352_v62, %v3252_v6 }
 0x290   :  { %v1687_v36 = vpack.c.bf16 %v1616_v19, %v1616_v19 }
 0x291   :  { %v1848_v14 = vrot.slane %v1688_v15, 4 }
 0x292   :  { %v1847_v35 = vrot.slane %v1687_v36, 4 }
 0x293   :  { %v1440_v20 = vpop.f32.mrf.mxu2  ;;  %v1529_v41 = vpop.f32.mrf.mxu3 }
 0x294   :  { %v1892_v50 = vsel %vm1872_vm0, %v1846_v60, %v1847_v35  ;;  %v1530_v61 = vadd.f32 %v1529_v41, %v1440_v20  ;;  %v1353_v10 = vpop.f32.mrf.mxu1  ;;  %v1620_v45 = vpop.f32.mrf.mxu0  ;;  %v3638_v60 = vld [vmem:[#allocation27_spill] sm:$0xff] }
 0x295   :  { %1956 = vst [vmem:[#allocation8 + $0x98] sm:$0xff] %v1892_v50  ;;  %v1354_v49 = vadd.f32 %v1353_v10, %v3256_v25 }
 0x296   :  { %v1619_v7 = vadd.f32 %v1618_v32, %v1530_v61 }
 0x297   :  { %v1690_v13 = vpack.c.bf16 %v1354_v49, %v3254_v33  ;;  %v3640_v49 = vld [vmem:[#allocation28_spill] sm:$0xff] }
 0x298   :  { %v1689_v24 = vpack.c.bf16 %v1619_v7, %v1619_v7 }
 0x299   :  { %v1850_v12 = vrot.slane %v1690_v13, 4 }
 0x29a   :  { %v1849_v23 = vrot.slane %v1689_v24, 4 }
 0x29b   :  { %v1442_v38 = vpop.f32.mrf.mxu2  ;;  %v1531_v54 = vpop.f32.mrf.mxu3 }
 0x29c   :  { %v1893_v30 = vsel %vm1872_vm0, %v1848_v14, %v1849_v23  ;;  %v1532_v9 = vadd.f32 %v1531_v54, %v1442_v38  ;;  %v1356_v2 = vpop.f32.mrf.mxu1  ;;  %v1623_v47 = vpop.f32.mrf.mxu0 }
 0x29d   :  { %1957 = vst [vmem:[#allocation8 + $0xa0] sm:$0xff] %v1893_v30  ;;  %v1357_v46 = vadd.f32 %v1356_v2, %v3264_v55 }
 0x29e   :  { %v1621_v18 = vadd.f32 %v1620_v45, %v1532_v9  ;;  %v3639_v45 = vld [vmem:[#allocation25_spill] sm:$0xff] }
 0x29f   :  { %v1692_v34 = vpack.c.bf16 %v1357_v46, %v3268_v43 }
 0x2a0   :  { %v1691_v53 = vpack.c.bf16 %v1621_v18, %v1621_v18  ;;  %v3641_v18 = vld [vmem:[#allocation30_spill] sm:$0xff] }
 0x2a1   :  { %v1852_v0 = vrot.slane %v1692_v34, 4 }
 0x2a2   :  { %v1851_v6 = vrot.slane %v1691_v53, 4 }
 0x2a3   :  { %v1445_v17 = vpop.f32.mrf.mxu2  ;;  %v1534_v3 = vpop.f32.mrf.mxu3 }
 0x2a4   :  { %v1894_v25 = vsel %vm1872_vm0, %v1850_v12, %v1851_v6  ;;  %v1535_v37 = vadd.f32 %v1534_v3, %v1445_v17  ;;  %v1358_v26 = vpop.f32.mrf.mxu1  ;;  %v1625_v44 = vpop.f32.mrf.mxu0  ;;  %v3642_v3 = vld [vmem:[#allocation29_spill] sm:$0xff] }
 0x2a5   :  { %1958 = vst [vmem:[#allocation8 + $0xa8] sm:$0xff] %v1894_v25  ;;  %v1359_v57 = vadd.f32 %v1358_v26, %v3272_v4 }
 0x2a6   :  { %v1624_v58 = vadd.f32 %v1623_v47, %v1535_v37 }
 0x2a7   :  { %v1694_v1 = vpack.c.bf16 %v1359_v57, %v3270_v59 }
 0x2a8   :  { %v1693_v8 = vpack.c.bf16 %v1624_v58, %v1624_v58 }
 0x2a9   :  { %v1854_v28 = vrot.slane %v1694_v1, 4 }
 0x2aa   :  { %v1853_v33 = vrot.slane %v1693_v8, 4  ;;  %v3643_v8 = vld [vmem:[#allocation17_spill] sm:$0xff] }
 0x2ab   :  { %v1447_v51 = vpop.f32.mrf.mxu2  ;;  %v1536_v22 = vpop.f32.mrf.mxu3 }
 0x2ac   :  { %v1895_v55 = vsel %vm1872_vm0, %v1852_v0, %v1853_v33  ;;  %v1537_v21 = vadd.f32 %v1536_v22, %v1447_v51  ;;  %v1361_v27 = vpop.f32.mrf.mxu1  ;;  %v1628_v56 = vpop.f32.mrf.mxu0 }
 0x2ad   :  { %1959 = vst [vmem:[#allocation8 + $0xb0] sm:$0xff] %v1895_v55  ;;  %v1362_v5 = vadd.f32 %v1361_v27, %v3636_v40 }
 0x2ae   :  { %v1626_v39 = vadd.f32 %v1625_v44, %v1537_v21  ;;  %v3644_v21 = vld [vmem:[#allocation31_spill] sm:$0xff] }
 0x2af   :  { %v1696_v32 = vpack.c.bf16 %v1362_v5, %v3637_v11 }
 0x2b0   :  { %v1695_v42 = vpack.c.bf16 %v1626_v39, %v1626_v39 }
 0x2b1   :  { %v1856_v36 = vrot.slane %v1696_v32, 4 }
 0x2b2   :  { %v1855_v43 = vrot.slane %v1695_v42, 4 }
 0x2b3   :  { %v1450_v31 = vpop.f32.mrf.mxu2  ;;  %v1539_v16 = vpop.f32.mrf.mxu3 }
 0x2b4   :  { %v1896_v4 = vsel %vm1872_vm0, %v1854_v28, %v1855_v43  ;;  %v1540_v52 = vadd.f32 %v1539_v16, %v1450_v31  ;;  %v1363_v29 = vpop.f32.mrf.mxu1  ;;  %v1630_v63 = vpop.f32.mrf.mxu0  ;;  %v3645_v43 = vld [vmem:[#allocation32_spill] sm:$0xff] }
 0x2b5   :  { %1960 = vst [vmem:[#allocation8 + $0xb8] sm:$0xff] %v1896_v4  ;;  %v1364_v35 = vadd.f32 %v1363_v29, %v3638_v60  ;;  %v3646_v29 = vld [vmem:[#allocation20_spill] sm:$0xff] }
 0x2b6   :  { %v1629_v48 = vadd.f32 %v1628_v56, %v1540_v52 }
 0x2b7   :  { %v1698_v15 = vpack.c.bf16 %v1364_v35, %v3639_v45 }
 0x2b8   :  { %v1697_v19 = vpack.c.bf16 %v1629_v48, %v1629_v48 }
 0x2b9   :  { %v1858_v14 = vrot.slane %v1698_v15, 4 }
 0x2ba   :  { %v1857_v59 = vrot.slane %v1697_v19, 4 }
 0x2bb   :  { %v1452_v62 = vpop.f32.mrf.mxu2  ;;  %v1541_v20 = vpop.f32.mrf.mxu3 }
 0x2bc   :  { %v1897_v41 = vsel %vm1872_vm0, %v1856_v36, %v1857_v59  ;;  %v1542_v50 = vadd.f32 %v1541_v20, %v1452_v62  ;;  %v1366_v61 = vpop.f32.mrf.mxu1  ;;  %v1633_v10 = vpop.f32.mrf.mxu0  ;;  %v3647_v59 = vld [vmem:[#allocation34_spill] sm:$0xff] }
 0x2bd   :  { %1961 = vst [vmem:[#allocation8 + $0xc0] sm:$0xff] %v1897_v41  ;;  %v1367_v38 = vadd.f32 %v1366_v61, %v3640_v49 }
 0x2be   :  { %v1631_v7 = vadd.f32 %v1630_v63, %v1542_v50  ;;  %v3648_v50 = vld [vmem:[#allocation33_spill] sm:$0xff] }
 0x2bf   :  { %v1700_v53 = vpack.c.bf16 %v1367_v38, %v3641_v18 }
 0x2c0   :  { %v1699_v24 = vpack.c.bf16 %v1631_v7, %v1631_v7 }
 0x2c1   :  { %v1860_v46 = vrot.slane %v1700_v53, 4 }
 0x2c2   :  { %v1859_v23 = vrot.slane %v1699_v24, 4 }
 0x2c3   :  { %v1455_v54 = vpop.f32.mrf.mxu2  ;;  %v1544_v30 = vpop.f32.mrf.mxu3 }
 0x2c4   :  { %v1898_v9 = vsel %vm1872_vm0, %v1858_v14, %v1859_v23  ;;  %v1545_v2 = vadd.f32 %v1544_v30, %v1455_v54  ;;  %v1368_v47 = vpop.f32.mrf.mxu1  ;;  %v1635_v13 = vpop.f32.mrf.mxu0  ;;  %v3649_v14 = vld [vmem:[#allocation35_spill] sm:$0xff] }
 0x2c5   :  { %1962 = vst [vmem:[#allocation8 + $0xc8] sm:$0xff] %v1898_v9  ;;  %v1369_v25 = vadd.f32 %v1368_v47, %v3642_v3 }
 0x2c6   :  { %v1634_v12 = vadd.f32 %v1633_v10, %v1545_v2  ;;  %v3650_v2 = vld [vmem:[#allocation38_spill] sm:$0xff] }
 0x2c7   :  { %v1702_v0 = vpack.c.bf16 %v1369_v25, %v3643_v8 }
 0x2c8   :  { %v1701_v6 = vpack.c.bf16 %v1634_v12, %v1634_v12 }
 0x2c9   :  { %v1862_v22 = vrot.slane %v1702_v0, 4 }
 0x2ca   :  { %v1861_v17 = vrot.slane %v1701_v6, 4 }
 0x2cb   :  { %v1457_v37 = vpop.f32.mrf.mxu2  ;;  %v1546_v26 = vpop.f32.mrf.mxu3 }
 0x2cc   :  { %v1899_v44 = vsel %vm1872_vm0, %v1860_v46, %v1861_v17  ;;  %v1547_v34 = vadd.f32 %v1546_v26, %v1457_v37  ;;  %v1371_v58 = vpop.f32.mrf.mxu1  ;;  %v1638_v57 = vpop.f32.mrf.mxu0  ;;  %v3651_v46 = vld [vmem:[#allocation36_spill] sm:$0xff] }
 0x2cd   :  { %1963 = vst [vmem:[#allocation8 + $0xd0] sm:$0xff] %v1899_v44  ;;  %v1372_v27 = vadd.f32 %v1371_v58, %v3644_v21 }
 0x2ce   :  { %v1636_v33 = vadd.f32 %v1635_v13, %v1547_v34 }
 0x2cf   :  { %v1704_v40 = vpack.c.bf16 %v1372_v27, %v3645_v43 }
 0x2d0   :  { %v1703_v51 = vpack.c.bf16 %v1636_v33, %v1636_v33 }
 0x2d1   :  { %v1864_v4 = vrot.slane %v1704_v40, 4 }
 0x2d2   :  { %v1863_v55 = vrot.slane %v1703_v51, 4 }
 0x2d3   :  { %v1460_v56 = vpop.f32.mrf.mxu2  ;;  %v1549_v1 = vpop.f32.mrf.mxu3 }
 0x2d4   :  { %v1900_v39 = vsel %vm1872_vm0, %v1862_v22, %v1863_v55  ;;  %v1550_v42 = vadd.f32 %v1549_v1, %v1460_v56  ;;  %v1373_v28 = vpop.f32.mrf.mxu1  ;;  %v1640_v16 = vpop.f32.mrf.mxu0 }
 0x2d5   :  { %1964 = vst [vmem:[#allocation8 + $0xd8] sm:$0xff] %v1900_v39  ;;  %v1374_v63 = vadd.f32 %v1373_v28, %v3646_v29 }
 0x2d6   :  { %v1639_v5 = vadd.f32 %v1638_v57, %v1550_v42 }
 0x2d7   :  { %v1706_v60 = vpack.c.bf16 %v1374_v63, %v3647_v59 }
 0x2d8   :  { %v1705_v31 = vpack.c.bf16 %v1639_v5, %v1639_v5 }
 0x2d9   :  { %v1866_v20 = vrot.slane %v1706_v60, 4 }
 0x2da   :  { %v1865_v52 = vrot.slane %v1705_v31, 4 }
 0x2db   :  { %v1462_v11 = vpop.f32.mrf.mxu2  ;;  %v1551_v32 = vpop.f32.mrf.mxu3 }
 0x2dc   :  { %v1901_v48 = vsel %vm1872_vm0, %v1864_v4, %v1865_v52  ;;  %v1552_v19 = vadd.f32 %v1551_v32, %v1462_v11  ;;  %v1376_v36 = vpop.f32.mrf.mxu1  ;;  %v1643_v10 = vpop.f32.mrf.mxu0 }
 0x2dd   :  { %1965 = vst [vmem:[#allocation8 + $0xe0] sm:$0xff] %v1901_v48  ;;  %v1377_v61 = vadd.f32 %v1376_v36, %v3648_v50 }
 0x2de   :  { %v1641_v35 = vadd.f32 %v1640_v16, %v1552_v19 }
 0x2df   :  { %v1708_v23 = vpack.c.bf16 %v1377_v61, %v3649_v14 }
 0x2e0   :  { %v1707_v62 = vpack.c.bf16 %v1641_v35, %v1641_v35 }
 0x2e1   :  { %v1868_v30 = vrot.slane %v1708_v23, 4 }
 0x2e2   :  { %v1867_v41 = vrot.slane %v1707_v62, 4 }
 0x2e3   :  { %v1465_v45 = vpop.f32.mrf.mxu2  ;;  %v1554_v15 = vpop.f32.mrf.mxu3 }
 0x2e4   :  { %v1902_v7 = vsel %vm1872_vm0, %v1866_v20, %v1867_v41  ;;  %v1555_v24 = vadd.f32 %v1554_v15, %v1465_v45  ;;  %v1378_v38 = vpop.f32.mrf.mxu1  ;;  %v1645_v6 = vpop.f32.mrf.mxu0 }
 0x2e5   :  { %1966 = vst [vmem:[#allocation8 + $0xe8] sm:$0xff] %v1902_v7  ;;  %v1379_v47 = vadd.f32 %v1378_v38, %v3650_v2 }
 0x2e6   :  { %v1644_v49 = vadd.f32 %v1643_v10, %v1555_v24 }
 0x2e7   :  { %v1710_v17 = vpack.c.bf16 %v1379_v47, %v3651_v46 }
 0x2e8   :  { %v1709_v54 = vpack.c.bf16 %v1644_v49, %v1644_v49 }
 0x2e9   :  { %v1870_v37 = vrot.slane %v1710_v17, 4 }
 0x2ea   :  { %v1869_v9 = vrot.slane %v1709_v54, 4 }
 0x2eb   :  { %v1467_v13 = vpop.f32.mrf.mxu2  ;;  %v1556_v18 = vpop.f32.mrf.mxu3 }
 0x2ec   :  { %v1903_v53 = vsel %vm1872_vm0, %v1868_v30, %v1869_v9  ;;  %v1557_v12 = vadd.f32 %v1556_v18, %v1467_v13 }
 0x2ed   :  { %1967 = vst [vmem:[#allocation8 + $0xf0] sm:$0xff] %v1903_v53 }
 0x2ee   :  { %v1646_v3 = vadd.f32 %v1645_v6, %v1557_v12 }
 0x2f0   :  { %v1711_v25 = vpack.c.bf16 %v1646_v3, %v1646_v3 }
 0x2f2   :  { %v1871_v26 = vrot.slane %v1711_v25, 4 }
 0x2f4   :  { %v1904_v44 = vsel %vm1872_vm0, %v1870_v37, %v1871_v26 }
 0x2f5   :  { %1968 = vst [vmem:[#allocation8 + $0xf8] sm:$0xff] %v1904_v44 }
 0x2f6   :  { %1994 = dma.vmem_to_hbm [thread:$0]  %s1987_s29, 4096, %s1989_s5, [#allocation9], %s2848_s6, %s2848_s6, %s2849_s7  }
 0x2f7   :  { %2836 = dma.done.wait [#allocation4], 2048  }
 0x2f8   :  { %2837 = vsyncadd [#allocation4], 4294965248 }
 0x2f9   :  { %2838 = dma.done.wait [#allocation9], 4096  }
 0x2fa   :  { %2839 = vsyncadd [#allocation9], 4294963200 }
 0x2fb   :  { %2003 = vsyncpa [#allocation3], 1 }
 0x2fc   :  { %2004 = vsyncpa [#allocation6], 1 }
 0x2fd   :  { %2005 = vsyncpa [#allocation4], 1 }
 0x2fe   :  { %2006 = vsyncpa [#allocation9], 1 }

</bundles_post_ra>
